<compile_context>
chip_gen: v7x
topology: tpu7x:2x2x1
jax: 0.10.0
libtpu: 0.0.40
codegen_flags: <defaults>
</compile_context>

<pallas_src>
import jax
import jax.numpy as jnp
from jax import lax
from jax.experimental import pallas as pl
from jax.experimental.pallas import tpu as pltpu

EPS = 1e-5
LANE = 128


def _round_up(x, m):
    return (x + m - 1) // m * m


# ---------------------------------------------------------------------------
# In-kernel helpers
# ---------------------------------------------------------------------------

def _reflect_pad_hw(p, hh, wh):
    """Reflect-pad a (hh, wh, c) tile by 1 in both spatial dims (PyTorch 'reflect')."""
    ph = jnp.concatenate([p[1:2], p, p[hh - 2:hh - 1]], axis=0)            # (hh+2, wh, c)
    pp = jnp.concatenate([ph[:, 1:2], ph, ph[:, wh - 2:wh - 1]], axis=1)   # (hh+2, wh+2, c)
    return pp


def _conv3x3_taps(pp, w_ref, bias, hh, wh, cpo):
    """3x3 conv of a reflect-padded tile as 9 accumulated MXU matmuls.

    pp    : (hh+2, wh+2, cpi) activation tile (MXU dtype)
    w_ref : (9, cpi, cpo) weights ref (MXU dtype); row k = tap (dy, dx) = (k//3, k%3)
    bias  : (1, cpo) f32
    returns (hh*wh, cpo) f32 accumulator (conv + bias).
    """
    # Bias folded into the accumulator init (single broadcast per tile).
    acc = jnp.zeros((hh * wh, cpo), jnp.float32) + bias
    for dy in range(3):
        for dx in range(3):
            xs = pp[dy:dy + hh, dx:dx + wh, :].reshape(hh * wh, -1)
            acc = acc + jnp.dot(xs, w_ref[dy * 3 + dx],
                                preferred_element_type=jnp.float32)
    return acc


# ---------------------------------------------------------------------------
# Kernels
# ---------------------------------------------------------------------------

def _make_pool_conv_kernel(hh, wh, cpi, cpo, mxu_dtype):
    """Fused 2x2 max-pool + conv1(+bias) + BN1 partial statistics (per batch elem)."""

    def kernel(x_ref, w_ref, b_ref, y_ref, st_ref):
        xb = x_ref[...]                                        # (2*hh, wh, 2*cpi) f32
        # W-pair max: the two W neighbours sit in the two 128-aligned lane halves.
        xw = jnp.maximum(xb[:, :, :cpi], xb[:, :, cpi:])       # (2*hh, wh, cpi)
        # H-pair max: adjacent rows (leading dim -> free reshape).
        xr = xw.reshape(hh, 2, wh, cpi)
        p = jnp.maximum(xr[:, 0], xr[:, 1])                    # (hh, wh, cpi)
        pp = _reflect_pad_hw(p.astype(mxu_dtype), hh, wh)
        acc = _conv3x3_taps(pp, w_ref, b_ref[...], hh, wh, cpo)
        y_ref[...] = acc.reshape(hh, wh, cpo)
        # BN stats fused while the fp32 conv accumulator is live (one pass).
        st_ref[0:1, :] = jnp.sum(acc, axis=0, keepdims=True)
        st_ref[1:2, :] = jnp.sum(acc * acc, axis=0, keepdims=True)

    return kernel


def _make_norm_conv_kernel(hh, wh, cpi, cpo, mxu_dtype):
    """Fused BN1-normalize + ReLU + conv2(+bias) + BN2 partial statistics."""

    def kernel(y_ref, sc_ref, sh_ref, w_ref, b_ref, o_ref, st_ref):
        a = jnp.maximum(y_ref[...] * sc_ref[...] + sh_ref[...], 0.0)   # (hh, wh, cpi) f32
        pp = _reflect_pad_hw(a.astype(mxu_dtype), hh, wh)
        acc = _conv3x3_taps(pp, w_ref, b_ref[...], hh, wh, cpo)
        o_ref[...] = acc.reshape(hh, wh, cpo)
        st_ref[0:1, :] = jnp.sum(acc, axis=0, keepdims=True)
        st_ref[1:2, :] = jnp.sum(acc * acc, axis=0, keepdims=True)

    return kernel


def _bn_relu_kernel(y_ref, sc_ref, sh_ref, o_ref):
    """Final BN2-normalize + ReLU epilogue."""
    o_ref[...] = jnp.maximum(y_ref[...] * sc_ref[...] + sh_ref[...], 0.0)


# ---------------------------------------------------------------------------
# pallas_call wrappers
# ---------------------------------------------------------------------------

def _compiler_params():
    return pltpu.CompilerParams(dimension_semantics=("parallel",))


def _pool_conv_call(x2, w, b, *, hh, wh, cpi, cpo, mxu_dtype):
    n = x2.shape[0]
    kernel = _make_pool_conv_kernel(hh, wh, cpi, cpo, mxu_dtype)
    flops = 2 * n * hh * wh * 9 * cpi * cpo
    bytes_accessed = int(x2.size * 4 + w.size * w.dtype.itemsize + b.size * 4
                         + n * hh * wh * cpo * 4 + n * 2 * cpo * 4)
    return pl.pallas_call(
        kernel,
        out_shape=(jax.ShapeDtypeStruct((n, hh, wh, cpo), jnp.float32),
                   jax.ShapeDtypeStruct((n, 2, cpo), jnp.float32)),
        grid=(n,),
        in_specs=[
            pl.BlockSpec((None, 2 * hh, wh, 2 * cpi), lambda i: (i, 0, 0, 0)),
            pl.BlockSpec((9, cpi, cpo), lambda i: (0, 0, 0)),
            pl.BlockSpec((1, cpo), lambda i: (0, 0)),
        ],
        out_specs=(
            pl.BlockSpec((None, hh, wh, cpo), lambda i: (i, 0, 0, 0)),
            pl.BlockSpec((None, 2, cpo), lambda i: (i, 0, 0)),
        ),
        compiler_params=_compiler_params(),
        cost_estimate=pl.CostEstimate(flops=flops, transcendentals=0,
                                      bytes_accessed=bytes_accessed),
    )(x2, w, b)


def _norm_conv_call(y, scale, shift, w, b, *, hh, wh, cpi, cpo, mxu_dtype):
    n = y.shape[0]
    kernel = _make_norm_conv_kernel(hh, wh, cpi, cpo, mxu_dtype)
    flops = 2 * n * hh * wh * 9 * cpi * cpo
    bytes_accessed = int(y.size * 4 + w.size * w.dtype.itemsize
                         + (b.size + scale.size + shift.size) * 4
                         + n * hh * wh * cpo * 4 + n * 2 * cpo * 4)
    return pl.pallas_call(
        kernel,
        out_shape=(jax.ShapeDtypeStruct((n, hh, wh, cpo), jnp.float32),
                   jax.ShapeDtypeStruct((n, 2, cpo), jnp.float32)),
        grid=(n,),
        in_specs=[
            pl.BlockSpec((None, hh, wh, cpi), lambda i: (i, 0, 0, 0)),
            pl.BlockSpec((1, cpi), lambda i: (0, 0)),
            pl.BlockSpec((1, cpi), lambda i: (0, 0)),
            pl.BlockSpec((9, cpi, cpo), lambda i: (0, 0, 0)),
            pl.BlockSpec((1, cpo), lambda i: (0, 0)),
        ],
        out_specs=(
            pl.BlockSpec((None, hh, wh, cpo), lambda i: (i, 0, 0, 0)),
            pl.BlockSpec((None, 2, cpo), lambda i: (i, 0, 0)),
        ),
        compiler_params=_compiler_params(),
        cost_estimate=pl.CostEstimate(flops=flops, transcendentals=0,
                                      bytes_accessed=bytes_accessed),
    )(y, scale, shift, w, b)


def _bn_relu_call(y, scale, shift, *, hh, wh, cp):
    n = y.shape[0]
    bytes_accessed = int(2 * y.size * 4 + (scale.size + shift.size) * 4)
    return pl.pallas_call(
        _bn_relu_kernel,
        out_shape=jax.ShapeDtypeStruct((n, hh, wh, cp), jnp.float32),
        grid=(n,),
        in_specs=[
            pl.BlockSpec((None, hh, wh, cp), lambda i: (i, 0, 0, 0)),
            pl.BlockSpec((1, cp), lambda i: (0, 0)),
            pl.BlockSpec((1, cp), lambda i: (0, 0)),
        ],
        out_specs=pl.BlockSpec((None, hh, wh, cp), lambda i: (i, 0, 0, 0)),
        compiler_params=_compiler_params(),
        cost_estimate=pl.CostEstimate(flops=int(2 * y.size), transcendentals=0,
                                      bytes_accessed=bytes_accessed),
    )(y, scale, shift)


# ---------------------------------------------------------------------------
# Parameter / stats glue (tiny per-channel math, done outside the kernels)
# ---------------------------------------------------------------------------

def _bn_scale_shift(stats, gamma, beta, count):
    """Combine per-batch-element (sum, sumsq) partials into folded BN scale/shift."""
    s = jnp.sum(stats[:, 0, :], axis=0)
    ss = jnp.sum(stats[:, 1, :], axis=0)
    mean = s / count
    var = jnp.maximum(ss / count - mean * mean, 0.0)       # biased variance (train mode)
    rstd = lax.rsqrt(var + EPS)
    scale = gamma.reshape(-1) * rstd
    shift = beta.reshape(-1) - mean * scale
    return (scale.reshape(1, -1).astype(jnp.float32),
            shift.reshape(1, -1).astype(jnp.float32))


def _pad_lane(v, cp):
    c = v.shape[-1]
    if c == cp:
        return v
    return jnp.pad(v, ((0, 0), (0, cp - c)))


def _pad_weight(w_hwio, cpi, cpo, dtype):
    kh, kw, ci, co = w_hwio.shape
    w = jnp.zeros((kh, kw, cpi, cpo), jnp.float32)
    w = w.at[:, :, :ci, :co].set(w_hwio)
    return w.reshape(kh * kw, cpi, cpo).astype(dtype)


# ---------------------------------------------------------------------------
# Public entry point (NCHW in / NCHW out, like the PyTorch module)
# ---------------------------------------------------------------------------

def downsampling_block(x_nchw, params, *, mxu_dtype=jnp.bfloat16):
    """MaxPool2d(2) -> (conv3x3 reflect -> BN(train) -> ReLU) x 2, fused Pallas kernels."""
    x = jnp.transpose(x_nchw, (0, 2, 3, 1)).astype(jnp.float32)   # NCHW -> NHWC
    n, h, w, ci = x.shape
    assert h % 2 == 0 and w % 2 == 0 and h >= 4 and w >= 4, (h, w)
    hh, wh = h // 2, w // 2

    co = params["w1"].shape[-1]
    # Lane-pad channels to a multiple of 128 so activations/stores are lane-dense.
    # (No-op for real UNet stages with C a multiple of 128; for C=64 this trades
    #  2x MXU flops for dense vregs -- drop the padding there if MXU-bound.)
    cpi = _round_up(ci, LANE)
    cpo = _round_up(co, LANE)
    if cpi > ci:
        x = jnp.pad(x, ((0, 0), (0, 0), (0, 0), (0, cpi - ci)))

    # Zero-copy view (N, H, W, Cp) -> (N, H, W/2, 2*Cp): the 2x2 pool is fused in
    # kernel 1 (no x00/x01/x10/x11 strided copies hit HBM).
    x2 = x.reshape(n, h, wh, 2 * cpi)

    w1 = _pad_weight(params["w1"], cpi, cpo, mxu_dtype)
    b1 = _pad_lane(params["b1"], cpo)
    g1 = _pad_lane(params["g1"], cpo)
    bt1 = _pad_lane(params["bt1"], cpo)
    w2 = _pad_weight(params["w2"], cpo, cpo, mxu_dtype)
    b2 = _pad_lane(params["b2"], cpo)
    g2 = _pad_lane(params["g2"], cpo)
    bt2 = _pad_lane(params["bt2"], cpo)

    count = n * hh * wh

    # Stage 1: pool + conv1 + BN1 partial stats.
    y1, st1 = _pool_conv_call(x2, w1, b1, hh=hh, wh=wh, cpi=cpi, cpo=cpo,
                              mxu_dtype=mxu_dtype)
    sc1, sh1 = _bn_scale_shift(st1, g1, bt1, count)

    # Stage 2: BN1-normalize + ReLU + conv2 + BN2 partial stats.
    y2, st2 = _norm_conv_call(y1, sc1, sh1, w2, b2, hh=hh, wh=wh, cpi=cpo, cpo=cpo,
                              mxu_dtype=mxu_dtype)
    sc2, sh2 = _bn_scale_shift(st2, g2, bt2, count)

    # Stage 3: final BN2-normalize + ReLU.
    out = _bn_relu_call(y2, sc2, sh2, hh=hh, wh=wh, cp=cpo)

    out = out[..., :co]                          # drop lane padding
    return jnp.transpose(out, (0, 3, 1, 2))      # NHWC -> NCHW


# ---------------------------------------------------------------------------
# Pure-JAX reference (mirrors the PyTorch forward in train mode)
# ---------------------------------------------------------------------------

def downsampling_block_ref(x_nchw, params):
    x = jnp.transpose(x_nchw, (0, 2, 3, 1)).astype(jnp.float32)
    n, h, w, ci = x.shape
    p = x.reshape(n, h // 2, 2, w // 2, 2, ci).max(axis=(2, 4))

    def conv(xin, wk, b):
        xp = jnp.pad(xin, ((0, 0), (1, 1), (1, 1), (0, 0)), mode="reflect")
        y = lax.conv_general_dilated(
            xp, wk, (1, 1), "VALID",
            dimension_numbers=("NHWC", "HWIO", "NHWC"),
            precision=lax.Precision.HIGHEST)
        return y + b

    def bn_relu(y, g, bt):
        m = y.mean(axis=(0, 1, 2), keepdims=True)
        v = ((y - m) ** 2).mean(axis=(0, 1, 2), keepdims=True)
        return jnp.maximum((y - m) / jnp.sqrt(v + EPS) * g + bt, 0.0)

    y = bn_relu(conv(p, params["w1"], params["b1"]), params["g1"], params["bt1"])
    y = bn_relu(conv(y, params["w2"], params["b2"]), params["g2"], params["bt2"])
    return jnp.transpose(y, (0, 3, 1, 2))


def init_params(key, channels_in, channels_out):
    """Deterministic synthetic parameters (Conv2d weights stored as HWIO)."""
    ks = jax.random.split(key, 8)
    w1 = jax.random.normal(ks[0], (3, 3, channels_in, channels_out), jnp.float32) * 0.2
    b1 = jax.random.normal(ks[1], (1, channels_out), jnp.float32) * 0.1
    g1 = 1.0 + 0.1 * jax.random.normal(ks[2], (1, channels_out), jnp.float32)
    bt1 = 0.1 * jax.random.normal(ks[3], (1, channels_out), jnp.float32)
    w2 = jax.random.normal(ks[4], (3, 3, channels_out, channels_out), jnp.float32) * 0.2
    b2 = jax.random.normal(ks[5], (1, channels_out), jnp.float32) * 0.1
    g2 = 1.0 + 0.1 * jax.random.normal(ks[6], (1, channels_out), jnp.float32)
    bt2 = 0.1 * jax.random.normal(ks[7], (1, channels_out), jnp.float32)
    return dict(w1=w1, b1=b1, g1=g1, bt1=bt1, w2=w2, b2=b2, g2=g2, bt2=bt2)


if __name__ == "__main__":
    key = jax.random.PRNGKey(0)
    k1, k2, k3, k4 = jax.random.split(key, 4)

    # Case 1: small shapes (batch=2, Cin=4, 16x16), as in the prompt.
    ci, co = 4, 8
    x = jax.random.normal(k1, (2, ci, 16, 16), jnp.float32)
    params = init_params(k2, ci, co)
    ref = downsampling_block_ref(x, params)

    out_f32 = jax.block_until_ready(downsampling_block(x, params, mxu_dtype=jnp.float32))
    assert out_f32.shape == (2, co, 8, 8), out_f32.shape
    assert jnp.allclose(out_f32, ref, atol=2e-2, rtol=2e-2), \
        float(jnp.max(jnp.abs(out_f32 - ref)))

    out_bf16 = jax.block_until_ready(downsampling_block(x, params, mxu_dtype=jnp.bfloat16))
    assert jnp.allclose(out_bf16, ref, atol=1e-1, rtol=1e-1), \
        float(jnp.max(jnp.abs(out_bf16 - ref)))

    # Case 2: realistic UNet channel counts (down_block_1: 64 -> 128) at reduced spatial size.
    ci2, co2 = 64, 128
    x_big = jax.random.normal(k3, (2, ci2, 32, 32), jnp.float32)
    params_big = init_params(k4, ci2, co2)
    ref_big = downsampling_block_ref(x_big, params_big)
    out_big = jax.block_until_ready(
        downsampling_block(x_big, params_big, mxu_dtype=jnp.bfloat16))
    assert out_big.shape == (2, co2, 16, 16), out_big.shape
    assert jnp.allclose(out_big, ref_big, atol=1e-1, rtol=1e-1), \
        float(jnp.max(jnp.abs(out_big - ref_big)))

    print("KERNEL_OK")
</pallas_src>

<mosaic_0001>
module attributes {stable_mosaic.version = 11 : i64} {
  func.func @kernel(%arg0: i32, %arg1: memref<1x16x8x256xf32, #tpu.memory_space<vmem>>, %arg2: memref<9x128x128xf32, #tpu.memory_space<vmem>>, %arg3: memref<1x128xf32, #tpu.memory_space<vmem>>, %arg4: memref<1x8x8x128xf32, #tpu.memory_space<vmem>>, %arg5: memref<1x2x128xf32, #tpu.memory_space<vmem>>) attributes {dimension_semantics = [#tpu.dimension_semantics<parallel>], iteration_bounds = array<i64: 2>, scalar_prefetch = 0 : i64, scratch_operands = 0 : i64, tpu.core_type = #tpu.core_type<tc>, window_params = [{transform_indices = @transform_0, window_bounds = array<i64: 1, 16, 8, 256>}, {pipeline_mode = #tpu.pipeline_mode<synchronous>, transform_indices = @transform_1, window_bounds = array<i64: 9, 128, 128>}, {pipeline_mode = #tpu.pipeline_mode<synchronous>, transform_indices = @transform_2, window_bounds = array<i64: 1, 128>}, {transform_indices = @transform_3, window_bounds = array<i64: 1, 8, 8, 128>}, {transform_indices = @transform_4, window_bounds = array<i64: 1, 2, 128>}]} {
    %c0 = arith.constant 0 : index
    %c0_0 = arith.constant 0 : index
    %c0_1 = arith.constant 0 : index
    %c0_2 = arith.constant 0 : index
    %0 = vector.load %arg1[%c0, %c0_0, %c0_1, %c0_2] : memref<1x16x8x256xf32, #tpu.memory_space<vmem>>, vector<1x16x8x256xf32>
    %1 = vector.shape_cast %0 : vector<1x16x8x256xf32> to vector<16x8x256xf32>
    %2 = vector.extract_strided_slice %1 {offsets = [0, 0, 0], sizes = [16, 8, 128], strides = [1, 1, 1]} : vector<16x8x256xf32> to vector<16x8x128xf32>
    %3 = vector.extract_strided_slice %1 {offsets = [0, 0, 128], sizes = [16, 8, 128], strides = [1, 1, 1]} : vector<16x8x256xf32> to vector<16x8x128xf32>
    %4 = arith.maximumf %2, %3 : vector<16x8x128xf32>
    %5 = vector.shape_cast %4 : vector<16x8x128xf32> to vector<8x2x8x128xf32>
    %6 = vector.extract_strided_slice %5 {offsets = [0, 0, 0, 0], sizes = [8, 1, 8, 128], strides = [1, 1, 1, 1]} : vector<8x2x8x128xf32> to vector<8x1x8x128xf32>
    %7 = vector.shape_cast %6 : vector<8x1x8x128xf32> to vector<8x8x128xf32>
    %8 = vector.extract_strided_slice %5 {offsets = [0, 1, 0, 0], sizes = [8, 1, 8, 128], strides = [1, 1, 1, 1]} : vector<8x2x8x128xf32> to vector<8x1x8x128xf32>
    %9 = vector.shape_cast %8 : vector<8x1x8x128xf32> to vector<8x8x128xf32>
    %10 = arith.maximumf %7, %9 : vector<8x8x128xf32>
    %11 = vector.extract_strided_slice %10 {offsets = [1, 0, 0], sizes = [1, 8, 128], strides = [1, 1, 1]} : vector<8x8x128xf32> to vector<1x8x128xf32>
    %12 = vector.extract_strided_slice %10 {offsets = [6, 0, 0], sizes = [1, 8, 128], strides = [1, 1, 1]} : vector<8x8x128xf32> to vector<1x8x128xf32>
    %13 = tpu.concatenate %11, %10, %12 in 0 : vector<1x8x128xf32>, vector<8x8x128xf32>, vector<1x8x128xf32> -> vector<10x8x128xf32>
    %14 = vector.extract_strided_slice %13 {offsets = [0, 1, 0], sizes = [10, 1, 128], strides = [1, 1, 1]} : vector<10x8x128xf32> to vector<10x1x128xf32>
    %15 = vector.extract_strided_slice %13 {offsets = [0, 6, 0], sizes = [10, 1, 128], strides = [1, 1, 1]} : vector<10x8x128xf32> to vector<10x1x128xf32>
    %16 = tpu.concatenate %14, %13, %15 in 1 : vector<10x1x128xf32>, vector<10x8x128xf32>, vector<10x1x128xf32> -> vector<10x10x128xf32>
    %c0_3 = arith.constant 0 : index
    %c0_4 = arith.constant 0 : index
    %17 = vector.load %arg3[%c0_3, %c0_4] : memref<1x128xf32, #tpu.memory_space<vmem>>, vector<1x128xf32>
    %cst = arith.constant 0.000000e+00 : f32
    %18 = vector.broadcast %cst : f32 to vector<64x128xf32>
    %19 = vector.broadcast %17 : vector<1x128xf32> to vector<64x128xf32>
    %20 = arith.addf %18, %19 : vector<64x128xf32>
    %21 = vector.extract_strided_slice %16 {offsets = [0, 0, 0], sizes = [8, 8, 128], strides = [1, 1, 1]} : vector<10x10x128xf32> to vector<8x8x128xf32>
    %22 = vector.shape_cast %21 : vector<8x8x128xf32> to vector<64x128xf32>
    %c0_5 = arith.constant 0 : index
    %c0_6 = arith.constant 0 : index
    %c0_7 = arith.constant 0 : index
    %23 = vector.load %arg2[%c0_5, %c0_6, %c0_7] : memref<9x128x128xf32, #tpu.memory_space<vmem>>, vector<1x128x128xf32>
    %24 = vector.shape_cast %23 : vector<1x128x128xf32> to vector<128x128xf32>
    %cst_8 = arith.constant dense<0.000000e+00> : vector<64x128xf32>
    %25 = tpu.matmul %22, %24, %cst_8 {dimension_numbers = #tpu.dot_dimension_numbers<[1], [0], [0], [1], [0, 0, 1, 1], [], []>} : vector<64x128xf32>, vector<128x128xf32>, vector<64x128xf32> -> vector<64x128xf32>
    %26 = arith.addf %20, %25 : vector<64x128xf32>
    %27 = vector.extract_strided_slice %16 {offsets = [0, 1, 0], sizes = [8, 8, 128], strides = [1, 1, 1]} : vector<10x10x128xf32> to vector<8x8x128xf32>
    %28 = vector.shape_cast %27 : vector<8x8x128xf32> to vector<64x128xf32>
    %c1 = arith.constant 1 : index
    %c0_9 = arith.constant 0 : index
    %c0_10 = arith.constant 0 : index
    %29 = vector.load %arg2[%c1, %c0_9, %c0_10] : memref<9x128x128xf32, #tpu.memory_space<vmem>>, vector<1x128x128xf32>
    %30 = vector.shape_cast %29 : vector<1x128x128xf32> to vector<128x128xf32>
    %cst_11 = arith.constant dense<0.000000e+00> : vector<64x128xf32>
    %31 = tpu.matmul %28, %30, %cst_11 {dimension_numbers = #tpu.dot_dimension_numbers<[1], [0], [0], [1], [0, 0, 1, 1], [], []>} : vector<64x128xf32>, vector<128x128xf32>, vector<64x128xf32> -> vector<64x128xf32>
    %32 = arith.addf %26, %31 : vector<64x128xf32>
    %33 = vector.extract_strided_slice %16 {offsets = [0, 2, 0], sizes = [8, 8, 128], strides = [1, 1, 1]} : vector<10x10x128xf32> to vector<8x8x128xf32>
    %34 = vector.shape_cast %33 : vector<8x8x128xf32> to vector<64x128xf32>
    %c2 = arith.constant 2 : index
    %c0_12 = arith.constant 0 : index
    %c0_13 = arith.constant 0 : index
    %35 = vector.load %arg2[%c2, %c0_12, %c0_13] : memref<9x128x128xf32, #tpu.memory_space<vmem>>, vector<1x128x128xf32>
    %36 = vector.shape_cast %35 : vector<1x128x128xf32> to vector<128x128xf32>
    %cst_14 = arith.constant dense<0.000000e+00> : vector<64x128xf32>
    %37 = tpu.matmul %34, %36, %cst_14 {dimension_numbers = #tpu.dot_dimension_numbers<[1], [0], [0], [1], [0, 0, 1, 1], [], []>} : vector<64x128xf32>, vector<128x128xf32>, vector<64x128xf32> -> vector<64x128xf32>
    %38 = arith.addf %32, %37 : vector<64x128xf32>
    %39 = vector.extract_strided_slice %16 {offsets = [1, 0, 0], sizes = [8, 8, 128], strides = [1, 1, 1]} : vector<10x10x128xf32> to vector<8x8x128xf32>
    %40 = vector.shape_cast %39 : vector<8x8x128xf32> to vector<64x128xf32>
    %c3 = arith.constant 3 : index
    %c0_15 = arith.constant 0 : index
    %c0_16 = arith.constant 0 : index
    %41 = vector.load %arg2[%c3, %c0_15, %c0_16] : memref<9x128x128xf32, #tpu.memory_space<vmem>>, vector<1x128x128xf32>
    %42 = vector.shape_cast %41 : vector<1x128x128xf32> to vector<128x128xf32>
    %cst_17 = arith.constant dense<0.000000e+00> : vector<64x128xf32>
    %43 = tpu.matmul %40, %42, %cst_17 {dimension_numbers = #tpu.dot_dimension_numbers<[1], [0], [0], [1], [0, 0, 1, 1], [], []>} : vector<64x128xf32>, vector<128x128xf32>, vector<64x128xf32> -> vector<64x128xf32>
    %44 = arith.addf %38, %43 : vector<64x128xf32>
    %45 = vector.extract_strided_slice %16 {offsets = [1, 1, 0], sizes = [8, 8, 128], strides = [1, 1, 1]} : vector<10x10x128xf32> to vector<8x8x128xf32>
    %46 = vector.shape_cast %45 : vector<8x8x128xf32> to vector<64x128xf32>
    %c4 = arith.constant 4 : index
    %c0_18 = arith.constant 0 : index
    %c0_19 = arith.constant 0 : index
    %47 = vector.load %arg2[%c4, %c0_18, %c0_19] : memref<9x128x128xf32, #tpu.memory_space<vmem>>, vector<1x128x128xf32>
    %48 = vector.shape_cast %47 : vector<1x128x128xf32> to vector<128x128xf32>
    %cst_20 = arith.constant dense<0.000000e+00> : vector<64x128xf32>
    %49 = tpu.matmul %46, %48, %cst_20 {dimension_numbers = #tpu.dot_dimension_numbers<[1], [0], [0], [1], [0, 0, 1, 1], [], []>} : vector<64x128xf32>, vector<128x128xf32>, vector<64x128xf32> -> vector<64x128xf32>
    %50 = arith.addf %44, %49 : vector<64x128xf32>
    %51 = vector.extract_strided_slice %16 {offsets = [1, 2, 0], sizes = [8, 8, 128], strides = [1, 1, 1]} : vector<10x10x128xf32> to vector<8x8x128xf32>
    %52 = vector.shape_cast %51 : vector<8x8x128xf32> to vector<64x128xf32>
    %c5 = arith.constant 5 : index
    %c0_21 = arith.constant 0 : index
    %c0_22 = arith.constant 0 : index
    %53 = vector.load %arg2[%c5, %c0_21, %c0_22] : memref<9x128x128xf32, #tpu.memory_space<vmem>>, vector<1x128x128xf32>
    %54 = vector.shape_cast %53 : vector<1x128x128xf32> to vector<128x128xf32>
    %cst_23 = arith.constant dense<0.000000e+00> : vector<64x128xf32>
    %55 = tpu.matmul %52, %54, %cst_23 {dimension_numbers = #tpu.dot_dimension_numbers<[1], [0], [0], [1], [0, 0, 1, 1], [], []>} : vector<64x128xf32>, vector<128x128xf32>, vector<64x128xf32> -> vector<64x128xf32>
    %56 = arith.addf %50, %55 : vector<64x128xf32>
    %57 = vector.extract_strided_slice %16 {offsets = [2, 0, 0], sizes = [8, 8, 128], strides = [1, 1, 1]} : vector<10x10x128xf32> to vector<8x8x128xf32>
    %58 = vector.shape_cast %57 : vector<8x8x128xf32> to vector<64x128xf32>
    %c6 = arith.constant 6 : index
    %c0_24 = arith.constant 0 : index
    %c0_25 = arith.constant 0 : index
    %59 = vector.load %arg2[%c6, %c0_24, %c0_25] : memref<9x128x128xf32, #tpu.memory_space<vmem>>, vector<1x128x128xf32>
    %60 = vector.shape_cast %59 : vector<1x128x128xf32> to vector<128x128xf32>
    %cst_26 = arith.constant dense<0.000000e+00> : vector<64x128xf32>
    %61 = tpu.matmul %58, %60, %cst_26 {dimension_numbers = #tpu.dot_dimension_numbers<[1], [0], [0], [1], [0, 0, 1, 1], [], []>} : vector<64x128xf32>, vector<128x128xf32>, vector<64x128xf32> -> vector<64x128xf32>
    %62 = arith.addf %56, %61 : vector<64x128xf32>
    %63 = vector.extract_strided_slice %16 {offsets = [2, 1, 0], sizes = [8, 8, 128], strides = [1, 1, 1]} : vector<10x10x128xf32> to vector<8x8x128xf32>
    %64 = vector.shape_cast %63 : vector<8x8x128xf32> to vector<64x128xf32>
    %c7 = arith.constant 7 : index
    %c0_27 = arith.constant 0 : index
    %c0_28 = arith.constant 0 : index
    %65 = vector.load %arg2[%c7, %c0_27, %c0_28] : memref<9x128x128xf32, #tpu.memory_space<vmem>>, vector<1x128x128xf32>
    %66 = vector.shape_cast %65 : vector<1x128x128xf32> to vector<128x128xf32>
    %cst_29 = arith.constant dense<0.000000e+00> : vector<64x128xf32>
    %67 = tpu.matmul %64, %66, %cst_29 {dimension_numbers = #tpu.dot_dimension_numbers<[1], [0], [0], [1], [0, 0, 1, 1], [], []>} : vector<64x128xf32>, vector<128x128xf32>, vector<64x128xf32> -> vector<64x128xf32>
    %68 = arith.addf %62, %67 : vector<64x128xf32>
    %69 = vector.extract_strided_slice %16 {offsets = [2, 2, 0], sizes = [8, 8, 128], strides = [1, 1, 1]} : vector<10x10x128xf32> to vector<8x8x128xf32>
    %70 = vector.shape_cast %69 : vector<8x8x128xf32> to vector<64x128xf32>
    %c8 = arith.constant 8 : index
    %c0_30 = arith.constant 0 : index
    %c0_31 = arith.constant 0 : index
    %71 = vector.load %arg2[%c8, %c0_30, %c0_31] : memref<9x128x128xf32, #tpu.memory_space<vmem>>, vector<1x128x128xf32>
    %72 = vector.shape_cast %71 : vector<1x128x128xf32> to vector<128x128xf32>
    %cst_32 = arith.constant dense<0.000000e+00> : vector<64x128xf32>
    %73 = tpu.matmul %70, %72, %cst_32 {dimension_numbers = #tpu.dot_dimension_numbers<[1], [0], [0], [1], [0, 0, 1, 1], [], []>} : vector<64x128xf32>, vector<128x128xf32>, vector<64x128xf32> -> vector<64x128xf32>
    %74 = arith.addf %68, %73 : vector<64x128xf32>
    %75 = vector.shape_cast %74 : vector<64x128xf32> to vector<8x8x128xf32>
    %c0_33 = arith.constant 0 : index
    %c0_34 = arith.constant 0 : index
    %c0_35 = arith.constant 0 : index
    %c0_36 = arith.constant 0 : index
    %76 = vector.load %arg4[%c0_33, %c0_34, %c0_35, %c0_36] : memref<1x8x8x128xf32, #tpu.memory_space<vmem>>, vector<1x8x8x128xf32>
    %77 = vector.shape_cast %76 : vector<1x8x8x128xf32> to vector<8x8x128xf32>
    %78 = vector.shape_cast %75 : vector<8x8x128xf32> to vector<1x8x8x128xf32>
    tpu.vector_store %arg4[%c0_33, %c0_34, %c0_35, %c0_36], %78 {strides = array<i32>} : memref<1x8x8x128xf32, #tpu.memory_space<vmem>>, vector<1x8x8x128xf32>,
    %cst_37 = arith.constant dense<0.000000e+00> : vector<128xf32>
    %79 = vector.multi_reduction <add>, %74, %cst_37 [0] : vector<64x128xf32> to vector<128xf32>
    %80 = vector.shape_cast %79 : vector<128xf32> to vector<1x128xf32>
    %c0_38 = arith.constant 0 : index
    %c0_39 = arith.constant 0 : index
    %c0_40 = arith.constant 0 : index
    %81 = vector.load %arg5[%c0_38, %c0_39, %c0_40] : memref<1x2x128xf32, #tpu.memory_space<vmem>>, vector<1x1x128xf32>
    %82 = vector.shape_cast %81 : vector<1x1x128xf32> to vector<1x128xf32>
    %83 = vector.shape_cast %80 : vector<1x128xf32> to vector<1x1x128xf32>
    tpu.vector_store %arg5[%c0_38, %c0_39, %c0_40], %83 {strides = array<i32>} : memref<1x2x128xf32, #tpu.memory_space<vmem>>, vector<1x1x128xf32>,
    %84 = arith.mulf %74, %74 : vector<64x128xf32>
    %cst_41 = arith.constant dense<0.000000e+00> : vector<128xf32>
    %85 = vector.multi_reduction <add>, %84, %cst_41 [0] : vector<64x128xf32> to vector<128xf32>
    %86 = vector.shape_cast %85 : vector<128xf32> to vector<1x128xf32>
    %c0_42 = arith.constant 0 : index
    %c1_43 = arith.constant 1 : index
    %c0_44 = arith.constant 0 : index
    %87 = vector.load %arg5[%c0_42, %c1_43, %c0_44] : memref<1x2x128xf32, #tpu.memory_space<vmem>>, vector<1x1x128xf32>
    %88 = vector.shape_cast %87 : vector<1x1x128xf32> to vector<1x128xf32>
    %89 = vector.shape_cast %86 : vector<1x128xf32> to vector<1x1x128xf32>
    tpu.vector_store %arg5[%c0_42, %c1_43, %c0_44], %89 {strides = array<i32>} : memref<1x2x128xf32, #tpu.memory_space<vmem>>, vector<1x1x128xf32>,
    return
  }
  func.func @transform_0(%arg0: i32) -> (i32, i32, i32, i32) {
    %c0_i32 = arith.constant 0 : i32
    %c0_i32_0 = arith.constant 0 : i32
    %c0_i32_1 = arith.constant 0 : i32
    %c0_i32_2 = arith.constant 0 : i32
    return %arg0, %c0_i32, %c0_i32_0, %c0_i32_1 : i32, i32, i32, i32
  }
  func.func @transform_1(%arg0: i32) -> (i32, i32, i32) {
    %c0_i32 = arith.constant 0 : i32
    %c0_i32_0 = arith.constant 0 : i32
    %c0_i32_1 = arith.constant 0 : i32
    %c0_i32_2 = arith.constant 0 : i32
    return %c0_i32, %c0_i32_0, %c0_i32_1 : i32, i32, i32
  }
  func.func @transform_2(%arg0: i32) -> (i32, i32) {
    %c0_i32 = arith.constant 0 : i32
    %c0_i32_0 = arith.constant 0 : i32
    %c0_i32_1 = arith.constant 0 : i32
    return %c0_i32, %c0_i32_0 : i32, i32
  }
  func.func @transform_3(%arg0: i32) -> (i32, i32, i32, i32) {
    %c0_i32 = arith.constant 0 : i32
    %c0_i32_0 = arith.constant 0 : i32
    %c0_i32_1 = arith.constant 0 : i32
    %c0_i32_2 = arith.constant 0 : i32
    return %arg0, %c0_i32, %c0_i32_0, %c0_i32_1 : i32, i32, i32, i32
  }
  func.func @transform_4(%arg0: i32) -> (i32, i32, i32) {
    %c0_i32 = arith.constant 0 : i32
    %c0_i32_0 = arith.constant 0 : i32
    %c0_i32_1 = arith.constant 0 : i32
    return %arg0, %c0_i32, %c0_i32_0 : i32, i32, i32
  }
}

</mosaic_0001>

<bundles_post_ra>
// kernel: tpu_custom_call.1
= control target key start
LH: loop header
LB: loop body
LE: loop exit
PB: predicated region body
PF: predicated region fallthrough
CT: control target
= control target key end

     0   :  { %10 = vsyncpa [#allocation3], 0  ;;  %s3602_s0 = inlined_call_operand.hbm [shape: f32[2,16,8,256], index: 0, kind: input, shape index: {}]   ;;  %s3603_s1 = inlined_call_operand.hbm [shape: f32[9,128,128], index: 1, kind: input, shape index: {}]   ;;  %s3604_s2 = inlined_call_operand.vmem [shape: f32[1,128], index: 2, kind: input, shape index: {}]   ;;  %s3605_s3 = inlined_call_operand.hbm [shape: f32[2,8,8,128], index: 3, kind: output, shape index: {0}]   ;;  %s3606_s4 = inlined_call_operand.hbm [shape: f32[2,2,128], index: 4, kind: output, shape index: {1}]  }
   0x1   :  { %12 = vsyncpa [#allocation3 + $0x1], 0 }
   0x2   :  { %13 = vsyncpa [#allocation6], 0 }
   0x3   :  { %14 = vsyncpa [#allocation4], 0 }
   0x4   :  { %16 = vsyncpa [#allocation4 + $0x1], 0 }
   0x5   :  { %17 = vsyncpa [#allocation9], 0 }
   0x6   :  { %19 = vsyncpa [#allocation9 + $0x1], 0  ;;  %s3096_s15 = smov 0   ;;  %s3098_s16 = smov 0  }
   0x7   :  { %s3100_s17 = smov 0   ;;  %s3102_s18 = smov 0  }
   0x8 LB: > { %s3117_s19 = sadd.s32 4294967295, %s3059_s18   ;;  %s1821_s20 = sadd.s32 4294967294, %s3059_s18   ;;  %s3059_s18 = sphi %s3102_s18, %s3626_s18   ;;  %s3055_s17 = sphi %s3100_s17, %s3625_s17   ;;  %s3051_s16 = sphi %s3098_s16, %s3624_s16   ;;  %s3047_s15 = sphi %s3096_s15, %s3623_s15  }
   0x9   : > { %p45_p0 = scmp.ne.s32.totalorder %s3051_s16, %s3047_s15  ;;  %p3607_p1 = scmp.eq.s32.totalorder %s3117_s19, 0 }
   0xa   : > { %p117_p3 = scmp.eq.s32.totalorder %s1821_s20, 1  ;;  %p1822_p5 = scmp.ge.s32.totalorder %s3059_s18, 1 }
   0xb   : > { %p3126_p4 = por %p3607_p1, %p45_p0  ;;  %p150_p7 = scmp.lt.s32.totalorder %s3059_s18, 3 }
   0xc   : > { %p3131_p6 = por %p117_p3, %p45_p0  ;;  %s3061_s24 = smov [#allocation5]  }
   0xd   : > { %s3610_s21 = scalar_select %p3126_p4, 1, 0 }
   0xe   : > { %s3611_s22 = scalar_select %p3131_p6, 1, 0 }
   0xf   : > { %p3136_p8 = pnand %p1822_p5, %p150_p7  ;;  %s162_s25 = sshll.u32 %s3061_s24, 4  ;;  %s3140_s25 = int_to_ptr.vmem [resolvable:$true] %s162_s25 }
  0x10   : > { %s3152_s27 = sadd.s32 1, %s3059_s18   ;;  %s32_s28 = sadd.s32 1, %s3055_s17 }
  0x11   : > { %s3612_s23 = scalar_select %p3136_p8, 1, 0 }
  0x12   : > { %p2841_p9 = pneg %p3136_p8  ;;  %s29_s29 = ssub.s32 %s3059_s18, %s3152_s27 }
  0x13   : > { %s2899_s6 = scalar_lea.hbm %s3603_s1, 18432 }
  0x14   : > { %p3147_p11 = pnand %p2841_p9, %p3607_p1  ;;  %p2900_p12 = scmp.ne.s32.totalorder %s3603_s1, %s2899_s6 }
  0x15   : > { %p2906_p5 = scmp.lt.u32.totalorder %s2899_s6, %s3603_s1 }
  0x16   : > { %p2901_p13 = pneg %p3147_p11 }
  0x18   : > { %p2902_p0 = pnand %p2901_p13, %p2900_p12 }
  0x1a   : > { %p2903_p3 = pneg %p2902_p0 }
  0x1c   : > { %p2908_p7 = pnand %p2906_p5, %p2903_p3 }
  0x1e   : > { %2911 = shalt.err (!%p2908_p7)
}
  0x1f   : > { %s2912_s11 = scalar_lea.vmem %s3140_s25, 18432  ;;  %p2920_p2 = scmp.lt.s32.totalorder %s3140_s25, %s3140_s25 }
  0x20   : > { %p2913_p9 = scmp.ne.s32.totalorder %s3140_s25, %s2912_s11  ;;  %p2921_p6 = scmp.lt.s32.totalorder %s2912_s11, %s2912_s11 }
  0x22   : > { %p2915_p10 = pnand %p2913_p9, %p2901_p13  ;;  %p2922_p4 = por %p2921_p6, %p2920_p2 }
  0x24   : > { %p2916_p1 = pneg %p2915_p10 }
  0x26   : > { %p2923_p8 = pnand %p2922_p4, %p2916_p1 }
  0x28   : > { %2926 = shalt.err (!%p2923_p8)
}
  0x29   : > { %s3062_s12 = smov 128   ;;  %s3063_s13 = smov 8  }
  0x2a   : > { %2844 = dma.hbm_to_vmem [thread:$0]  (!%p3147_p11), %s3603_s1, 18432, %s3140_s25, [#allocation6], %s3062_s12, %s3062_s12, %s3063_s13  }
  0x2b   : > { %p30_p2 = scmp.eq.s32.totalorder %s29_s29, 0  ;;  %p39_p1 = scmp.ne.s32.totalorder %s3055_s17, %s3051_s16 }
  0x2c   : > { %p40_p4 = scmp.eq.s32.totalorder %s3059_s18, 0  ;;  %p2857_p6 = scmp.lt.s32.totalorder %s3059_s18, 2 }
  0x2d   : > { %s3183_s24 = scalar_select %p30_p2, %s3055_s17, %s32_s28  }
  0x2e   : > { %p41_p8 = por %p40_p4, %p39_p1  ;;  %p3614_p10 = scmp.eq.s32.totalorder %s3117_s19, 1 }
  0x2f   : > { %s179_s5 = sand.u32 1, %s3055_s17   ;;  %s1841_s6 = sshll.u32 %s3059_s18, 12 }
  0x30   : > { %p3187_p12 = por %p3614_p10, %p39_p1  ;;  %s1825_s7 = sshll.u32 %s179_s5, 8 }
  0x31   : > { %s3196_s9 = scalar_lea.hbm %s3602_s0, %s1841_s6  ;;  %s183_s25 = scalar_lea.vmem [#allocation2], %s1825_s7 }
  0x32   : > { %s190_s28 = sshll.u32 %s183_s25, 4  ;;  %p3198_p11 = pnand %p2857_p6, %p41_p8  ;;  %s3202_s28 = int_to_ptr.vmem [resolvable:$true] %s190_s28 }
  0x33   : > { %s3204_s10 = scalar_lea.sflag [#allocation3], %s179_s5  ;;  %s2927_s11 = scalar_lea.hbm %s3196_s9, 4096 }
  0x34   : > { %p2928_p13 = scmp.ne.s32.totalorder %s3196_s9, %s2927_s11  ;;  %p2929_p0 = pneg %p3198_p11 }
  0x35   : > { %s2932_s14 = scalar_lea.hbm %s3602_s0, 8192  ;;  %p2933_p7 = scmp.lt.u32.totalorder %s3196_s9, %s3602_s0 }
  0x36   : > { %p2930_p3 = pnand %p2929_p0, %p2928_p13  ;;  %p2934_p9 = scmp.lt.u32.totalorder %s2932_s14, %s2927_s11 }
  0x37   : > { %p2936_p1 = scmp.lt.u32.totalorder %s2927_s11, %s3196_s9 }
  0x38   : > { %p2931_p5 = pneg %p2930_p3  ;;  %p2935_p2 = por %p2934_p9, %p2933_p7 }
  0x3a   : > { %p2937_p4 = por %p2936_p1, %p2935_p2 }
  0x3c   : > { %p2938_p6 = pnand %p2937_p4, %p2931_p5 }
  0x3e   : > { %2941 = shalt.err (!%p2938_p6)
}
  0x3f   : > { %s2942_s5 = scalar_lea.vmem %s3202_s28, 4096  ;;  %s3064_s7 = smov [#allocation2]  }
  0x40   : > { %p2943_p8 = scmp.ne.s32.totalorder %s3202_s28, %s2942_s5  ;;  %s2947_s26 = sshll.u32 %s3064_s7, 4  ;;  %s2948_s26 = int_to_ptr.vmem [resolvable:$false] %s2947_s26 }
  0x41   : > { %s2949_s8 = scalar_lea.vmem %s2948_s26, 8192  ;;  %p2950_p3 = scmp.lt.s32.totalorder %s3202_s28, %s2948_s26 }
  0x42   : > { %p2945_p10 = pnand %p2943_p8, %p2929_p0  ;;  %p2951_p7 = scmp.lt.s32.totalorder %s2949_s8, %s2942_s5 }
  0x44   : > { %p2946_p13 = pneg %p2945_p10  ;;  %p2952_p9 = por %p2951_p7, %p2950_p3 }
  0x46   : > { %p2953_p2 = pnand %p2952_p9, %p2946_p13 }
  0x48   : > { %2956 = shalt.err (!%p2953_p2)
}
  0x49   : > { %s3065_s25 = smov 256   ;;  %s3066_s11 = smov 16  }
  0x4a   : > { %2848 = dma.hbm_to_vmem [thread:$0]  (!%p3198_p11), %s3196_s9, 4096, %s3202_s28, %s3204_s10, %s3065_s25, %s3065_s25, %s3066_s11  }
  0x4b   : > { %p3617_p0 = scmp.ne.s32.totalorder %s3612_s23, 0 }
  0x4c   : > { %s3235_s12 = sand.u32 (!%p3617_p0), 1, %s3051_s16   ;;  %p3618_p5 = scmp.ne.s32.totalorder (!%p3617_p0), %s3610_s21, 0 }
  0x4d   : > { %202 = sbr.rel (%p3617_p0) target bundleno = 522 (0x20a), region = 32  ;;  %s1829_s13 = sshll.u32 (!%p3617_p0), %s3235_s12, 8 }
  0x4e   : > { %s205_s14 = scalar_lea.sflag (!%p3617_p0), [#allocation3], %s3235_s12  ;;  %s3239_s20 = scalar_lea.vmem (!%p3617_p0), [#allocation2], %s1829_s13 }
  0x54   : > { %3030 = dma.done.wait (%p3618_p5), %s205_s14, 4096  }
  0x55   : > { %3032 = vsyncadd (%p3618_p5), %s205_s14, 4294963200  ;;  %p3619_p11 = scmp.eq.s32.totalorder %s3117_s19, 0 }
  0x57   : > { %3034 = dma.done.wait (%p3619_p11), [#allocation6], 18432   ;;  %p3620_p1 = pmov %p3619_p11 }
  0x58   : > { %v379_v0 = vld [vmem:[#allocation5] sm:$0xff]  ;;  %v380_v1 = vld [vmem:[#allocation5 + $0x8] sm:$0xff]  ;;  %v381_v5 = vld [vmem:[#allocation5 + $0x10] sm:$0xff]  ;;  %vm354_vm0 = vcmask 1040384   ;;  %vm522_vm1 = vcmask 1046528   ;;  %vm681_vm2 = vcmask 1045504  }
  0x59   : > { %3036 = vsyncadd (%p3620_p1), [#allocation6], 4294948864  ;;  %v977_v2 = vld [vmem:[#allocation5 + $0x200] sm:$0xff]  ;;  %v2455_v3 = vpack.c.bf16 %v380_v1, %v379_v0  ;;  %v978_v4 = vld [vmem:[#allocation5 + $0x208] sm:$0xff]  ;;  %s1831_s9 = sshll.u32 %s3235_s12, 6  ;;  %s1842_s10 = sshll.u32 %s3117_s19, 10 }
  0x5a   : > { %v382_v6 = vld [vmem:[#allocation5 + $0x18] sm:$0xff]  ;;  %v2583_v7 = vpack.c.bf16 %v978_v4, %v977_v2  ;;  %v979_v9 = vld [vmem:[#allocation5 + $0x210] sm:$0xff]  ;;  %v383_v11 = vld [vmem:[#allocation5 + $0x20] sm:$0xff]  ;;  %s234_s28 = scalar_lea.vmem [#allocation7], %s1831_s9  ;;  %s3521_s7 = scalar_lea.hbm %s3605_s3, %s1842_s10 }
  0x5b   : > { %v2459_v8 = vpack.c.bf16 %v382_v6, %v381_v5  ;;  %v980_v10 = vld [vmem:[#allocation5 + $0x218] sm:$0xff]  ;;  %2456 = vmatprep.subr.bf16.mxu1 %v2455_v3  ;;  %v384_v13 = vld [vmem:[#allocation5 + $0x28] sm:$0xff]  ;;  %v981_v14 = vld [vmem:[#allocation5 + $0x220] sm:$0xff]  ;;  %s1693_s29 = sshll.u32 %s234_s28, 4  ;;  %s1675_s26 = scalar_lea.sflag [#allocation4], %s3235_s12  ;;  %s3516_s29 = int_to_ptr.vmem [resolvable:$true] %s1693_s29 }
  0x5c   : > { %v2587_v12 = vpack.c.bf16 %v980_v10, %v979_v9  ;;  %v982_v15 = vld [vmem:[#allocation5 + $0x228] sm:$0xff]  ;;  %2584 = vmatprep.subr.bf16.mxu0 %v2583_v7  ;;  %2458 = vmatpush3.bf16.msra.mxu1 %v2455_v3  ;;  %v2463_v16 = vpack.c.bf16 %v384_v13, %v383_v11  ;;  %v385_v18 = vld [vmem:[#allocation5 + $0x30] sm:$0xff]  ;;  %v386_v19 = vld [vmem:[#allocation5 + $0x38] sm:$0xff]  ;;  %s2957_s8 = scalar_lea.vmem %s3516_s29, 1024  ;;  %s3067_s25 = smov [#allocation7]  }
  0x5d   : > { %2586 = vmatpush3.bf16.msra.mxu0 %v2583_v7  ;;  %2460 = vmatprep.subr.bf16.mxu1 %v2459_v8  ;;  %v2591_v17 = vpack.c.bf16 %v982_v15, %v981_v14  ;;  %v983_v20 = vld [vmem:[#allocation5 + $0x230] sm:$0xff]  ;;  %v984_v21 = vld [vmem:[#allocation5 + $0x238] sm:$0xff]  ;;  %v2467_v22 = vpack.c.bf16 %v386_v19, %v385_v18  ;;  %v387_v23 = vld [vmem:[#allocation5 + $0x40] sm:$0xff]  ;;  %p2958_p4 = scmp.ne.s32.totalorder %s3516_s29, %s2957_s8  ;;  %s2961_s11 = sshll.u32 %s3067_s25, 4  ;;  %s2962_s11 = int_to_ptr.vmem [resolvable:$false] %s2961_s11 }
  0x5e   : > { %2588 = vmatprep.subr.bf16.mxu0 %v2587_v12  ;;  %v388_v24 = vld [vmem:[#allocation5 + $0x48] sm:$0xff]  ;;  %v2595_v25 = vpack.c.bf16 %v984_v21, %v983_v20  ;;  %v985_v26 = vld [vmem:[#allocation5 + $0x240] sm:$0xff]  ;;  %v248_v30 = vld [vmem:[%s3239_s20 + $0x30] sm:$0xff]  ;;  %s2963_s13 = scalar_lea.vmem %s2962_s11, 2048  ;;  %p2964_p10 = scmp.lt.s32.totalorder %s3516_s29, %s2962_s11 }
  0x5f   : > { %v986_v27 = vld [vmem:[#allocation5 + $0x248] sm:$0xff]  ;;  %v246_v28 = vld [vmem:[%s3239_s20 + $0x20] sm:$0xff]  ;;  %v249_v31 = vld [vmem:[%s3239_s20 + $0x38] sm:$0xff]  ;;  %v2471_v36 = vpack.c.bf16 %v388_v24, %v387_v23  ;;  %p2959_p6 = pnand %p2958_p4, %p3187_p12  ;;  %p2965_p13 = scmp.lt.s32.totalorder %s2963_s13, %s2957_s8 }
  0x60   : > { %2462 = vmatpush3.bf16.msra.mxu1 %v2459_v8  ;;  %v247_v29 = vld [vmem:[%s3239_s20 + $0x28] sm:$0xff]  ;;  %v389_v32 = vld [vmem:[#allocation5 + $0x50] sm:$0xff]  ;;  %v277_v34 = vmax.f32 %v248_v30, %v249_v31  ;;  %v242_v35 = vld [vmem:[%s3239_s20] sm:$0xff]  ;;  %v2599_v40 = vpack.c.bf16 %v986_v27, %v985_v26 }
  0x61   : > { %2590 = vmatpush3.bf16.msra.mxu0 %v2587_v12  ;;  %2464 = vmatprep.subr.bf16.mxu1 %v2463_v16  ;;  %v276_v33 = vmax.f32 %v246_v28, %v247_v29  ;;  %v243_v37 = vld [vmem:[%s3239_s20 + $0x8] sm:$0xff]  ;;  %v244_v38 = vld [vmem:[%s3239_s20 + $0x10] sm:$0xff]  ;;  %v245_v39 = vld [vmem:[%s3239_s20 + $0x18] sm:$0xff]  ;;  %p2960_p8 = pneg %p2959_p6  ;;  %p2966_p3 = por %p2965_p13, %p2964_p10 }
  0x62   : > { %2592 = vmatprep.subr.bf16.mxu0 %v2591_v17  ;;  %v390_v41 = vld [vmem:[#allocation5 + $0x58] sm:$0xff]  ;;  %v987_v42 = vld [vmem:[#allocation5 + $0x250] sm:$0xff]  ;;  %v274_v45 = vmax.f32 %v242_v35, %v243_v37  ;;  %v275_v46 = vmax.f32 %v244_v38, %v245_v39  ;;  %v391_v52 = vld [vmem:[#allocation5 + $0x60] sm:$0xff] }
  0x63   : > { %v988_v43 = vld [vmem:[#allocation5 + $0x258] sm:$0xff]  ;;  %v291_v44 = vmax.f32 %v276_v33, %v277_v34  ;;  %v2475_v50 = vpack.c.bf16 %v390_v41, %v389_v32  ;;  %v392_v53 = vld [vmem:[#allocation5 + $0x68] sm:$0xff]  ;;  %v989_v54 = vld [vmem:[#allocation5 + $0x260] sm:$0xff]  ;;  %p2967_p7 = pnand %p2966_p3, %p2960_p8 }
  0x64   : > { %2466 = vmatpush3.bf16.msra.mxu1 %v2463_v16  ;;  %v290_v49 = vmax.f32 %v274_v45, %v275_v46  ;;  %v2603_v51 = vpack.c.bf16 %v988_v43, %v987_v42  ;;  %v990_v55 = vld [vmem:[#allocation5 + $0x268] sm:$0xff]  ;;  %v393_v56 = vld [vmem:[#allocation5 + $0x70] sm:$0xff]  ;;  %v394_v61 = vld [vmem:[#allocation5 + $0x78] sm:$0xff]  ;;  %v2479_v6 = vpack.c.bf16 %v392_v53, %v391_v52 }
  0x65   : > { %2594 = vmatpush3.bf16.msra.mxu0 %v2591_v17  ;;  %2468 = vmatprep.subr.bf16.mxu1 %v2467_v22  ;;  %v306_v47 = vrot.slane %v291_v44, 1  ;;  %v322_v48 = vrot.slane %v291_v44, 7  ;;  %v991_v62 = vld [vmem:[#allocation5 + $0x270] sm:$0xff]  ;;  %v992_v63 = vld [vmem:[#allocation5 + $0x278] sm:$0xff]  ;;  %v552_v0 = vld [vmem:[#allocation5 + $0x80] sm:$0xff]  ;;  %v338_v4 = vrot.slane %v291_v44, 5  ;;  %v2607_v12 = vpack.c.bf16 %v990_v55, %v989_v54 }
  0x66   : > { %2596 = vmatprep.subr.bf16.mxu0 %v2595_v25  ;;  %v307_v58 = vrot.slane %v290_v49, 1  ;;  %v323_v59 = vrot.slane %v290_v49, 7  ;;  %v339_v60 = vrot.slane %v290_v49, 5  ;;  %v553_v1 = vld [vmem:[#allocation5 + $0x88] sm:$0xff]  ;;  %v250_v5 = vld [vmem:[%s3239_s20 + $0x40] sm:$0xff]  ;;  %v252_v10 = vld [vmem:[%s3239_s20 + $0x50] sm:$0xff]  ;;  %v3274_v17 = vpack.c.bf16 %v394_v61, %v393_v56 }
  0x67   : > { %v3258_v57 = vsel %vm354_vm0, %v306_v47, %v322_v48  ;;  %v251_v9 = vld [vmem:[%s3239_s20 + $0x48] sm:$0xff]  ;;  %v253_v11 = vld [vmem:[%s3239_s20 + $0x58] sm:$0xff]  ;;  %v1111_v13 = vld [vmem:[#allocation5 + $0x280] sm:$0xff]  ;;  %v3276_v18 = vpack.c.bf16 %v992_v63, %v991_v62  ;;  %v3286_v24 = vsel %vm354_vm0, %v322_v48, %v338_v4  ;;  %v3289_v28 = vpack.c.bf16 %v553_v1, %v552_v0 }
  0x68   : > { %2470 = vmatpush3.bf16.msra.mxu1 %v2467_v22  ;;  %2091 = vmatprep.mubr.f32.mxu1 %v3258_v57  ;;  %v3262_v2 = vsel %vm354_vm0, %v307_v58, %v323_v59  ;;  %v3265_v3 = vsel %vm354_vm0, %v323_v59, %v339_v60  ;;  %v1112_v14 = vld [vmem:[#allocation5 + $0x288] sm:$0xff]  ;;  %v278_v15 = vmax.f32 %v250_v5, %v251_v9  ;;  %v254_v16 = vld [vmem:[%s3239_s20 + $0x60] sm:$0xff]  ;;  %v256_v22 = vld [vmem:[%s3239_s20 + $0x70] sm:$0xff]  ;;  %v523_v34 = vrot.slane %v3258_v57, 1 }
  0x69   : > { %2598 = vmatpush3.bf16.msra.mxu0 %v2595_v25  ;;  %2472 = vmatprep.subr.bf16.mxu1 %v2471_v36  ;;  %v526_v7 = vrot.slane %v3262_v2, 1  ;;  %v527_v8 = vrot.slane %v3265_v3, 1  ;;  %v279_v20 = vmax.f32 %v252_v10, %v253_v11  ;;  %v255_v21 = vld [vmem:[%s3239_s20 + $0x68] sm:$0xff]  ;;  %v257_v23 = vld [vmem:[%s3239_s20 + $0x78] sm:$0xff]  ;;  %v258_v27 = vld [vmem:[%s3239_s20 + $0x80] sm:$0xff]  ;;  %v3291_v29 = vpack.c.bf16 %v1112_v14, %v1111_v13 }
  0x6a   : > { %2600 = vmatprep.subr.bf16.mxu0 %v2599_v40  ;;  %v280_v25 = vmax.f32 %v254_v16, %v255_v21  ;;  %v281_v26 = vmax.f32 %v256_v22, %v257_v23  ;;  %v259_v31 = vld [vmem:[%s3239_s20 + $0x88] sm:$0xff]  ;;  %v260_v32 = vld [vmem:[%s3239_s20 + $0x90] sm:$0xff]  ;;  %v261_v33 = vld [vmem:[%s3239_s20 + $0x98] sm:$0xff] }
  0x6b   : > { %v3279_v19 = vsel %vm522_vm1, %v526_v7, %v527_v8  ;;  %v292_v30 = vmax.f32 %v278_v15, %v279_v20  ;;  %v554_v35 = vld [vmem:[#allocation5 + $0x90] sm:$0xff]  ;;  %v282_v37 = vmax.f32 %v258_v27, %v259_v31  ;;  %v283_v38 = vmax.f32 %v260_v32, %v261_v33  ;;  %v262_v39 = vld [vmem:[%s3239_s20 + $0xa0] sm:$0xff]  ;;  %v555_v41 = vld [vmem:[#allocation5 + $0x98] sm:$0xff] }
  0x6c   : > { %2474 = vmatpush3.bf16.msra.mxu1 %v2471_v36  ;;  %2267 = vmatprep.mubr.f32.mxu0 %v3279_v19  ;;  %v293_v36 = vmax.f32 %v280_v25, %v281_v26  ;;  %v263_v45 = vld [vmem:[%s3239_s20 + $0xa8] sm:$0xff]  ;;  %v1113_v46 = vld [vmem:[#allocation5 + $0x290] sm:$0xff]  ;;  %v1114_v47 = vld [vmem:[#allocation5 + $0x298] sm:$0xff]  ;;  %v2491_v4 = vpack.c.bf16 %v555_v41, %v554_v35 }
  0x6d   : > { %2602 = vmatpush3.bf16.msra.mxu0 %v2599_v40  ;;  %2476 = vmatprep.subr.bf16.mxu1 %v2475_v50  ;;  %v524_v40 = vrot.slane %v3286_v24, 1  ;;  %v308_v42 = vrot.slane %v292_v30, 1  ;;  %v324_v43 = vrot.slane %v292_v30, 7  ;;  %v340_v44 = vrot.slane %v292_v30, 5  ;;  %v556_v48 = vld [vmem:[#allocation5 + $0xa0] sm:$0xff]  ;;  %v557_v53 = vld [vmem:[#allocation5 + $0xa8] sm:$0xff] }
  0x6e   : > { %2604 = vmatprep.subr.bf16.mxu0 %v2603_v51  ;;  %v309_v49 = vrot.slane %v293_v36, 1  ;;  %v294_v52 = vmax.f32 %v282_v37, %v283_v38  ;;  %v264_v56 = vld [vmem:[%s3239_s20 + $0xb0] sm:$0xff]  ;;  %v265_v58 = vld [vmem:[%s3239_s20 + $0xb8] sm:$0xff]  ;;  %v284_v59 = vmax.f32 %v262_v39, %v263_v45  ;;  %v266_v0 = vld [vmem:[%s3239_s20 + $0xc0] sm:$0xff]  ;;  %v3320_v5 = vpack.c.bf16 %v1114_v47, %v1113_v46 }
  0x6f   : > { %v3302_v54 = vsel %vm354_vm0, %v308_v42, %v324_v43  ;;  %v3305_v55 = vsel %vm354_vm0, %v324_v43, %v340_v44  ;;  %v267_v1 = vld [vmem:[%s3239_s20 + $0xc8] sm:$0xff]  ;;  %v268_v8 = vld [vmem:[%s3239_s20 + $0xd0] sm:$0xff]  ;;  %v269_v9 = vld [vmem:[%s3239_s20 + $0xd8] sm:$0xff]  ;;  %v3327_v11 = vsel %vm522_vm1, %v523_v34, %v524_v40  ;;  %v285_v14 = vmax.f32 %v264_v56, %v265_v58 }
  0x70   : > { %2478 = vmatpush3.bf16.msra.mxu1 %v2475_v50  ;;  %v325_v50 = vrot.slane %v293_v36, 7  ;;  %v529_v60 = vrot.slane %v3302_v54, 1  ;;  %v530_v61 = vrot.slane %v3305_v55, 1  ;;  %v326_v7 = vrot.slane %v294_v52, 7  ;;  %v270_v10 = vld [vmem:[%s3239_s20 + $0xe0] sm:$0xff]  ;;  %v271_v15 = vld [vmem:[%s3239_s20 + $0xe8] sm:$0xff] }
  0x71   : > { %2606 = vmatpush3.bf16.msra.mxu0 %v2603_v51  ;;  %2480 = vmatprep.subr.bf16.mxu1 %v2479_v6  ;;  %v341_v51 = vrot.slane %v293_v36, 5  ;;  %v342_v13 = vrot.slane %v294_v52, 5  ;;  %v272_v16 = vld [vmem:[%s3239_s20 + $0xf0] sm:$0xff]  ;;  %v273_v20 = vld [vmem:[%s3239_s20 + $0xf8] sm:$0xff]  ;;  %v286_v23 = vmax.f32 %v266_v0, %v267_v1  ;;  %v1115_v25 = vld [vmem:[#allocation5 + $0x2a0] sm:$0xff]  ;;  %v287_v31 = vmax.f32 %v268_v8, %v269_v9 }
  0x72   : > { %2608 = vmatprep.subr.bf16.mxu0 %v2607_v12  ;;  %v3313_v62 = vsel %vm354_vm0, %v309_v49, %v325_v50  ;;  %v1116_v26 = vld [vmem:[#allocation5 + $0x2a8] sm:$0xff]  ;;  %v3343_v27 = vsel %vm522_vm1, %v529_v60, %v530_v61  ;;  %v288_v34 = vmax.f32 %v270_v10, %v271_v15  ;;  %v289_v35 = vmax.f32 %v272_v16, %v273_v20  ;;  %v558_v43 = vld [vmem:[#allocation5 + $0xb0] sm:$0xff]  ;;  %v559_v44 = vld [vmem:[#allocation5 + $0xb8] sm:$0xff] }
  0x73   : > { %v3316_v63 = vsel %vm354_vm0, %v325_v50, %v341_v51  ;;  %v532_v21 = vrot.slane %v3313_v62, 1  ;;  %v3346_v30 = vsel %vm354_vm0, %v326_v7, %v342_v13  ;;  %v296_v39 = vmax.f32 %v286_v23, %v287_v31  ;;  %v1117_v47 = vld [vmem:[#allocation5 + $0x2b0] sm:$0xff]  ;;  %v1119_v10 = vld [vmem:[#allocation5 + $0x2c0] sm:$0xff]  ;;  %v1120_v13 = vld [vmem:[#allocation5 + $0x2c8] sm:$0xff] }
  0x74   : > { %2482 = vmatpush3.bf16.msra.mxu1 %v2479_v6  ;;  %v310_v6 = vrot.slane %v294_v52, 1  ;;  %v533_v22 = vrot.slane %v3316_v63, 1  ;;  %v536_v33 = vrot.slane %v3346_v30, 1  ;;  %v2623_v40 = vpack.c.bf16 %v1116_v26, %v1115_v25  ;;  %v562_v26 = vld [vmem:[#allocation5 + $0xd0] sm:$0xff]  ;;  %v1122_v31 = vld [vmem:[#allocation5 + $0x2d8] sm:$0xff] }
  0x75   : > { %2610 = vmatpush3.bf16.msra.mxu0 %v2607_v12  ;;  %2484 = vmatprep.subr.bf16.mxu1 %v3274_v17  ;;  %v3329_v12 = vpack.c.bf16 %v557_v53, %v556_v48  ;;  %v297_v42 = vmax.f32 %v288_v34, %v289_v35  ;;  %v312_v46 = vrot.slane %v296_v39, 1  ;;  %v1118_v48 = vld [vmem:[#allocation5 + $0x2b8] sm:$0xff]  ;;  %v344_v51 = vrot.slane %v296_v39, 5  ;;  %v564_v34 = vld [vmem:[#allocation5 + $0xe0] sm:$0xff]  ;;  %v565_v35 = vld [vmem:[#allocation5 + $0xe8] sm:$0xff] }
  0x76   : > { %2612 = vmatprep.subr.bf16.mxu0 %v3276_v18  ;;  %v3355_v41 = vsel %vm522_vm1, %v532_v21, %v533_v22  ;;  %v2499_v60 = vpack.c.bf16 %v559_v44, %v558_v43  ;;  %v685_v20 = vrot.slane %v3262_v2, 2  ;;  %v686_v21 = vrot.slane %v3265_v3, 2  ;;  %v1125_v43 = vld [vmem:[#allocation5 + $0x2f0] sm:$0xff]  ;;  %v1126_v44 = vld [vmem:[#allocation5 + $0x2f8] sm:$0xff] }
  0x77   : > { %v313_v52 = vrot.slane %v297_v42, 1  ;;  %v329_v58 = vrot.slane %v297_v42, 7  ;;  %v2631_v25 = vpack.c.bf16 %v1120_v13, %v1119_v10  ;;  %v691_v13 = vrot.slane %v3313_v62, 2 }
  0x78   : > { %2486 = vmatpush3.bf16.msra.mxu1 %v3274_v17  ;;  %v3339_v17 = vsel %vm354_vm0, %v310_v6, %v326_v7  ;;  %v560_v6 = vld [vmem:[#allocation5 + $0xc0] sm:$0xff]  ;;  %v561_v7 = vld [vmem:[#allocation5 + $0xc8] sm:$0xff]  ;;  %v3412_v3 = vsel %vm681_vm2, %v685_v20, %v686_v21 }
  0x79   : > { %2614 = vmatpush3.bf16.msra.mxu0 %v3276_v18  ;;  %2488 = vmatprep.subr.bf16.mxu1 %v3289_v28  ;;  %v295_v18 = vmax.f32 %v284_v59, %v285_v14  ;;  %v535_v32 = vrot.slane %v3339_v17, 1  ;;  %v345_v59 = vrot.slane %v297_v42, 5  ;;  %v2503_v22 = vpack.c.bf16 %v561_v7, %v560_v6  ;;  %v567_v42 = vld [vmem:[#allocation5 + $0xf8] sm:$0xff]  ;;  %v715_v20 = vld [vmem:[#allocation5 + $0x120] sm:$0xff]  ;;  %v716_v21 = vld [vmem:[#allocation5 + $0x128] sm:$0xff] }
  0x7a   : > { %2616 = vmatprep.subr.bf16.mxu0 %v3291_v29  ;;  %v1244_v6 = vld [vmem:[#allocation5 + $0x318] sm:$0xff]  ;;  %v688_v7 = vrot.slane %v3302_v54, 2 }
  0x7b   : > { %2092 = vmatmul.mubr.f32.vlgmr.msra.gmra.mrb[0].mxu1 %v3262_v2  ;;  %v311_v36 = vrot.slane %v295_v18, 1  ;;  %v327_v37 = vrot.slane %v295_v18, 7  ;;  %v343_v38 = vrot.slane %v295_v18, 5  ;;  %v3371_v53 = vsel %vm522_vm1, %v535_v32, %v536_v33  ;;  %v1121_v18 = vld [vmem:[#allocation5 + $0x2d0] sm:$0xff] }
  0x7c   : > { %2490 = vmatpush3.bf16.msra.mxu1 %v3289_v28  ;;  %2268 = vmatmul.mubr.f32.vlgmr.msra.gmra.mrb[0].mxu0 %v3327_v11  ;;  %v3391_v9 = vsel %vm354_vm0, %v329_v58, %v345_v59  ;;  %v2635_v33 = vpack.c.bf16 %v1122_v31, %v1121_v18 }
  0x7d   : > { %2618 = vmatpush3.bf16.msra.mxu0 %v3291_v29  ;;  %2492 = vmatprep.subr.bf16.mxu1 %v2491_v4  ;;  %v3360_v28 = vsel %vm354_vm0, %v311_v36, %v327_v37  ;;  %v3363_v45 = vsel %vm354_vm0, %v327_v37, %v343_v38  ;;  %v328_v29 = vrot.slane %v296_v39, 7  ;;  %v973_v15 = vrot.slane %v3391_v9, 1  ;;  %v1123_v36 = vld [vmem:[#allocation5 + $0x2e0] sm:$0xff]  ;;  %v1124_v37 = vld [vmem:[#allocation5 + $0x2e8] sm:$0xff] }
  0x7e   : > { %2620 = vmatprep.subr.bf16.mxu0 %v3320_v5  ;;  %2094 = vmatprep.mubr.f32.mxu1 %v3258_v57  ;;  %v538_v49 = vrot.slane %v3360_v28, 1  ;;  %v539_v50 = vrot.slane %v3363_v45, 1  ;;  %v2511_v38 = vpack.c.bf16 %v565_v35, %v564_v34  ;;  %v2639_v39 = vpack.c.bf16 %v1124_v37, %v1123_v36  ;;  %v718_v34 = vld [vmem:[#allocation5 + $0x138] sm:$0xff]  ;;  %v1247_v35 = vld [vmem:[#allocation5 + $0x330] sm:$0xff] }
  0x7f   : > { %2270 = vmatprep.mubr.f32.mxu0 %v3343_v27  ;;  %2095 = vmatmul.mubr.f32.gmra.mrb[2].mxu1 %v3302_v54  ;;  %v3374_v56 = vsel %vm354_vm0, %v312_v46, %v328_v29  ;;  %v3382_v0 = vsel %vm354_vm0, %v328_v29, %v344_v51  ;;  %v2643_v29 = vpack.c.bf16 %v1126_v44, %v1125_v43  ;;  %v683_v51 = vrot.slane %v3286_v24, 2  ;;  %v1248_v36 = vld [vmem:[#allocation5 + $0x338] sm:$0xff]  ;;  %v719_v44 = vld [vmem:[#allocation5 + $0x140] sm:$0xff] }
  0x80   : > { %2494 = vmatpush3.bf16.msra.mxu1 %v2491_v4  ;;  %2271 = vmatmul.mubr.f32.gmra.mrb[2].mxu0 %v3355_v41  ;;  %v3379_v61 = vsel %vm522_vm1, %v538_v49, %v539_v50  ;;  %v541_v1 = vrot.slane %v3374_v56, 1  ;;  %v2627_v4 = vpack.c.bf16 %v1118_v48, %v1117_v47  ;;  %v542_v8 = vrot.slane %v3382_v0, 1  ;;  %v711_v47 = vld [vmem:[#allocation5 + $0x100] sm:$0xff]  ;;  %v712_v48 = vld [vmem:[#allocation5 + $0x108] sm:$0xff] }
  0x81   : > { %2622 = vmatpush3.bf16.msra.mxu0 %v3320_v5  ;;  %2496 = vmatprep.subr.bf16.mxu1 %v3329_v12  ;;  %v3388_v5 = vsel %vm354_vm0, %v313_v52, %v329_v58  ;;  %v1241_v49 = vld [vmem:[#allocation5 + $0x300] sm:$0xff]  ;;  %v1242_v50 = vld [vmem:[#allocation5 + $0x308] sm:$0xff]  ;;  %v2519_v52 = vpack.c.bf16 %v712_v48, %v711_v47  ;;  %v682_v58 = vrot.slane %v3258_v57, 2  ;;  %v698_v31 = vrot.slane %v3363_v45, 2 }
  0x82   : > { %2624 = vmatprep.subr.bf16.mxu0 %v2623_v40  ;;  %2097 = vmatprep.mubr.f32.mxu1 %v3313_v62  ;;  %v972_v14 = vrot.slane %v3388_v5, 1  ;;  %v3400_v16 = vsel %vm522_vm1, %v541_v1, %v542_v8  ;;  %v2647_v59 = vpack.c.bf16 %v1242_v50, %v1241_v49  ;;  %v714_v1 = vld [vmem:[#allocation5 + $0x118] sm:$0xff]  ;;  %v689_v8 = vrot.slane %v3305_v55, 2  ;;  %v1250_v47 = vld [vmem:[#allocation5 + $0x348] sm:$0xff]  ;;  %v721_v50 = vld [vmem:[#allocation5 + $0x150] sm:$0xff] }
  0x83   : > { %2273 = vmatprep.mubr.f32.mxu0 %v3371_v53  ;;  %2098 = vmatmul.mubr.f32.gmra.mrb[4].mxu1 %v3339_v17  ;;  %v3421_v24 = vsel %vm681_vm2, %v682_v58, %v683_v51  ;;  %v700_v45 = vrot.slane %v3374_v56, 2  ;;  %v701_v37 = vrot.slane %v3382_v0, 2  ;;  %v2659_v43 = vpack.c.bf16 %v1248_v36, %v1247_v35  ;;  %v722_v51 = vld [vmem:[#allocation5 + $0x158] sm:$0xff] }
  0x84   : > { %2498 = vmatpush3.bf16.msra.mxu1 %v3329_v12  ;;  %2274 = vmatmul.mubr.f32.gmra.mrb[4].mxu0 %v3379_v61  ;;  %v3405_v23 = vsel %vm522_vm1, %v972_v14, %v973_v15  ;;  %v563_v12 = vld [vmem:[#allocation5 + $0xd8] sm:$0xff]  ;;  %v692_v14 = vrot.slane %v3316_v63, 2  ;;  %v3428_v55 = vsel %vm681_vm2, %v688_v7, %v689_v8  ;;  %v2527_v63 = vpack.c.bf16 %v716_v21, %v715_v20  ;;  %v1254_v7 = vld [vmem:[#allocation5 + $0x368] sm:$0xff] }
  0x85   : > { %2626 = vmatpush3.bf16.msra.mxu0 %v2623_v40  ;;  %2500 = vmatprep.subr.bf16.mxu1 %v2499_v60  ;;  %v2507_v32 = vpack.c.bf16 %v563_v12, %v562_v26  ;;  %v566_v40 = vld [vmem:[#allocation5 + $0xf0] sm:$0xff]  ;;  %v694_v26 = vrot.slane %v3339_v17, 2  ;;  %v695_v12 = vrot.slane %v3346_v30, 2  ;;  %v3456_v0 = vsel %vm681_vm2, %v700_v45, %v701_v37  ;;  %v1252_v58 = vld [vmem:[#allocation5 + $0x358] sm:$0xff]  ;;  %v845_v37 = vld [vmem:[#allocation5 + $0x1a0] sm:$0xff] }
  0x86   : > { %2628 = vmatprep.subr.bf16.mxu0 %v2627_v4  ;;  %2100 = vmatprep.mubr.f32.mxu1 %v3360_v28  ;;  %v2515_v46 = vpack.c.bf16 %v567_v42, %v566_v40  ;;  %v3433_v18 = vsel %vm681_vm2, %v691_v13, %v692_v14  ;;  %v1106_v40 = vrot.slane %v3388_v5, 2  ;;  %v1107_v42 = vrot.slane %v3391_v9, 2  ;;  %v725_v13 = vld [vmem:[#allocation5 + $0x170] sm:$0xff]  ;;  %v726_v14 = vld [vmem:[#allocation5 + $0x178] sm:$0xff] }
  0x87   : > { %2276 = vmatprep.mubr.f32.mxu0 %v3400_v16  ;;  %2101 = vmatmul.mubr.f32.gmra.mrb[6].mxu1 %v3374_v56  ;;  %v3442_v30 = vsel %vm681_vm2, %v694_v26, %v695_v12  ;;  %v1256_v20 = vld [vmem:[#allocation5 + $0x378] sm:$0xff]  ;;  %v2547_v21 = vpack.c.bf16 %v726_v14, %v725_v13  ;;  %v842_v26 = vld [vmem:[#allocation5 + $0x188] sm:$0xff]  ;;  %v1371_v12 = vld [vmem:[#allocation5 + $0x380] sm:$0xff] }
  0x88   : > { %2502 = vmatpush3.bf16.msra.mxu1 %v2499_v60  ;;  %2277 = vmatmul.mubr.f32.gmra.mrb[6].mxu0 %v3405_v23  ;;  %v713_v60 = vld [vmem:[#allocation5 + $0x110] sm:$0xff]  ;;  %v3459_v48 = vsel %vm681_vm2, %v1106_v40, %v1107_v42  ;;  %v1374_v35 = vld [vmem:[#allocation5 + $0x398] sm:$0xff]  ;;  %v1375_v40 = vld [vmem:[#allocation5 + $0x3a0] sm:$0xff] }
  0x89   : > { %2630 = vmatpush3.bf16.msra.mxu0 %v2627_v4  ;;  %2504 = vmatprep.subr.bf16.mxu1 %v2503_v22  ;;  %v1243_v4 = vld [vmem:[#allocation5 + $0x310] sm:$0xff]  ;;  %v2523_v10 = vpack.c.bf16 %v714_v1, %v713_v60  ;;  %v723_v1 = vld [vmem:[#allocation5 + $0x160] sm:$0xff]  ;;  %v1376_v42 = vld [vmem:[#allocation5 + $0x3a8] sm:$0xff] }
  0x8a   : > { %2632 = vmatprep.subr.bf16.mxu0 %v2631_v25  ;;  %2135 = vmatprep.mubr.f32.mxu1 %v3327_v11  ;;  %v2651_v15 = vpack.c.bf16 %v1244_v6, %v1243_v4  ;;  %v724_v4 = vld [vmem:[#allocation5 + $0x168] sm:$0xff]  ;;  %v1253_v6 = vld [vmem:[#allocation5 + $0x360] sm:$0xff] }
  0x8b   : > { %2311 = vmatprep.mubr.f32.mxu0 %v3412_v3  ;;  %v2543_v8 = vpack.c.bf16 %v724_v4, %v723_v1  ;;  %v851_v1 = vld [vmem:[#allocation5 + $0x1d0] sm:$0xff]  ;;  %v852_v4 = vld [vmem:[#allocation5 + $0x1d8] sm:$0xff]  ;;  %v853_v13 = vld [vmem:[#allocation5 + $0x1e0] sm:$0xff] }
  0x8c   : > { %2506 = vmatpush3.bf16.msra.mxu1 %v2503_v22  ;;  %v1245_v22 = vld [vmem:[#allocation5 + $0x320] sm:$0xff]  ;;  %v854_v14 = vld [vmem:[#allocation5 + $0x1e8] sm:$0xff] }
  0x8d   : > { %2634 = vmatpush3.bf16.msra.mxu0 %v2631_v25  ;;  %2508 = vmatprep.subr.bf16.mxu1 %v2507_v32  ;;  %v1246_v25 = vld [vmem:[#allocation5 + $0x328] sm:$0xff] }
  0x8e   : > { %2636 = vmatprep.subr.bf16.mxu0 %v2635_v33 }
  0x90   : > { %2510 = vmatpush3.bf16.msra.mxu1 %v2507_v32  ;;  %v2655_v32 = vpack.c.bf16 %v1246_v25, %v1245_v22  ;;  %v841_v25 = vld [vmem:[#allocation5 + $0x180] sm:$0xff] }
  0x91   : > { %2638 = vmatpush3.bf16.msra.mxu0 %v2635_v33  ;;  %2512 = vmatprep.subr.bf16.mxu1 %v2511_v38  ;;  %v717_v33 = vld [vmem:[#allocation5 + $0x130] sm:$0xff] }
  0x92   : > { %2640 = vmatprep.subr.bf16.mxu0 %v2639_v39 }
  0x94   : > { %2514 = vmatpush3.bf16.msra.mxu1 %v2511_v38  ;;  %v2531_v38 = vpack.c.bf16 %v718_v34, %v717_v33  ;;  %v844_v33 = vld [vmem:[#allocation5 + $0x198] sm:$0xff]  ;;  %v1373_v34 = vld [vmem:[#allocation5 + $0x390] sm:$0xff] }
  0x95   : > { %2642 = vmatpush3.bf16.msra.mxu0 %v2639_v39  ;;  %2516 = vmatprep.subr.bf16.mxu1 %v2515_v46  ;;  %v2683_v45 = vpack.c.bf16 %v1374_v35, %v1373_v34  ;;  %v1504_v34 = vld [vmem:[#allocation5 + $0x418] sm:$0xff] }
  0x96   : > { %2644 = vmatprep.subr.bf16.mxu0 %v2643_v29 }
  0x98   : > { %2518 = vmatpush3.bf16.msra.mxu1 %v2515_v46  ;;  %v720_v46 = vld [vmem:[#allocation5 + $0x148] sm:$0xff] }
  0x99   : > { %2646 = vmatpush3.bf16.msra.mxu0 %v2643_v29  ;;  %2520 = vmatprep.subr.bf16.mxu1 %v2519_v52  ;;  %v1249_v29 = vld [vmem:[#allocation5 + $0x340] sm:$0xff]  ;;  %v2535_v9 = vpack.c.bf16 %v720_v46, %v719_v44  ;;  %v2687_v44 = vpack.c.bf16 %v1376_v42, %v1375_v40  ;;  %v847_v46 = vld [vmem:[#allocation5 + $0x1b0] sm:$0xff]  ;;  %v1508_v40 = vld [vmem:[#allocation5 + $0x438] sm:$0xff] }
  0x9a   : > { %2648 = vmatprep.subr.bf16.mxu0 %v2647_v59  ;;  %v2663_v49 = vpack.c.bf16 %v1250_v47, %v1249_v29  ;;  %v848_v29 = vld [vmem:[#allocation5 + $0x1b8] sm:$0xff]  ;;  %v1377_v47 = vld [vmem:[#allocation5 + $0x3b0] sm:$0xff] }
  0x9b   : > { %2136 = vmatmul.mubr.f32.vlgmr.msra.gmra.mrb[0].mxu1 %v3279_v19  ;;  %v697_v19 = vrot.slane %v3360_v28, 2 }
  0x9c   : > { %2522 = vmatpush3.bf16.msra.mxu1 %v2519_v52  ;;  %2312 = vmatmul.mubr.f32.vlgmr.msra.gmra.mrb[0].mxu0 %v3421_v24  ;;  %v1251_v52 = vld [vmem:[#allocation5 + $0x350] sm:$0xff] }
  0x9d   : > { %2650 = vmatpush3.bf16.msra.mxu0 %v2647_v59  ;;  %2524 = vmatprep.subr.bf16.mxu1 %v2523_v10  ;;  %v3447_v39 = vsel %vm681_vm2, %v697_v19, %v698_v31  ;;  %v2539_v59 = vpack.c.bf16 %v722_v51, %v721_v50  ;;  %v2667_v60 = vpack.c.bf16 %v1252_v58, %v1251_v52  ;;  %v849_v50 = vld [vmem:[#allocation5 + $0x1c0] sm:$0xff]  ;;  %v850_v51 = vld [vmem:[#allocation5 + $0x1c8] sm:$0xff] }
  0x9e   : > { %2652 = vmatprep.subr.bf16.mxu0 %v2651_v15  ;;  %2138 = vmatprep.mubr.f32.mxu1 %v3327_v11  ;;  %v2551_v19 = vpack.c.bf16 %v842_v26, %v841_v25  ;;  %v1379_v52 = vld [vmem:[#allocation5 + $0x3c0] sm:$0xff]  ;;  %v1380_v58 = vld [vmem:[#allocation5 + $0x3c8] sm:$0xff]  ;;  %v855_v25 = vld [vmem:[#allocation5 + $0x1f0] sm:$0xff] }
  0x9f   : > { %2314 = vmatprep.mubr.f32.mxu0 %v3428_v55  ;;  %2139 = vmatmul.mubr.f32.gmra.mrb[2].mxu1 %v3343_v27  ;;  %v856_v26 = vld [vmem:[#allocation5 + $0x1f8] sm:$0xff] }
  0xa0   : > { %2526 = vmatpush3.bf16.msra.mxu1 %v2523_v10  ;;  %2315 = vmatmul.mubr.f32.gmra.mrb[2].mxu0 %v3433_v18  ;;  %v2671_v10 = vpack.c.bf16 %v1254_v7, %v1253_v6  ;;  %v1381_v6 = vld [vmem:[#allocation5 + $0x3d0] sm:$0xff]  ;;  %v1382_v7 = vld [vmem:[#allocation5 + $0x3d8] sm:$0xff] }
  0xa1   : > { %2654 = vmatpush3.bf16.msra.mxu0 %v2651_v15  ;;  %2528 = vmatprep.subr.bf16.mxu1 %v2527_v63  ;;  %v1255_v15 = vld [vmem:[#allocation5 + $0x370] sm:$0xff] }
  0xa2   : > { %2656 = vmatprep.subr.bf16.mxu0 %v2655_v32  ;;  %2141 = vmatprep.mubr.f32.mxu1 %v3355_v41  ;;  %v2675_v22 = vpack.c.bf16 %v1256_v20, %v1255_v15  ;;  %v1383_v15 = vld [vmem:[#allocation5 + $0x3e0] sm:$0xff]  ;;  %v1384_v20 = vld [vmem:[#allocation5 + $0x3e8] sm:$0xff] }
  0xa3   : > { %2317 = vmatprep.mubr.f32.mxu0 %v3442_v30  ;;  %2142 = vmatmul.mubr.f32.gmra.mrb[4].mxu1 %v3371_v53 }
  0xa4   : > { %2530 = vmatpush3.bf16.msra.mxu1 %v2527_v63  ;;  %2318 = vmatmul.mubr.f32.gmra.mrb[4].mxu0 %v3447_v39  ;;  %v1372_v63 = vld [vmem:[#allocation5 + $0x388] sm:$0xff] }
  0xa5   : > { %2658 = vmatpush3.bf16.msra.mxu0 %v2655_v32  ;;  %2532 = vmatprep.subr.bf16.mxu1 %v2531_v38  ;;  %v2679_v31 = vpack.c.bf16 %v1372_v63, %v1371_v12  ;;  %v843_v32 = vld [vmem:[#allocation5 + $0x190] sm:$0xff]  ;;  %v1386_v63 = vld [vmem:[#allocation5 + $0x3f8] sm:$0xff] }
  0xa6   : > { %2660 = vmatprep.subr.bf16.mxu0 %v2659_v43  ;;  %2144 = vmatprep.mubr.f32.mxu1 %v3379_v61  ;;  %v2555_v36 = vpack.c.bf16 %v844_v33, %v843_v32  ;;  %v1385_v12 = vld [vmem:[#allocation5 + $0x3f0] sm:$0xff]  ;;  %v1502_v32 = vld [vmem:[#allocation5 + $0x408] sm:$0xff] }
  0xa7   : > { %2320 = vmatprep.mubr.f32.mxu0 %v3456_v0  ;;  %2145 = vmatmul.mubr.f32.gmra.mrb[6].mxu1 %v3400_v16  ;;  %v1503_v33 = vld [vmem:[#allocation5 + $0x410] sm:$0xff] }
  0xa8   : > { %2534 = vmatpush3.bf16.msra.mxu1 %v2531_v38  ;;  %2321 = vmatmul.mubr.f32.gmra.mrb[6].mxu0 %v3459_v48  ;;  %v846_v38 = vld [vmem:[#allocation5 + $0x1a8] sm:$0xff]  ;;  %v2715_v35 = vpack.c.bf16 %v1504_v34, %v1503_v33 }
  0xa9   : > { %2662 = vmatpush3.bf16.msra.mxu0 %v2659_v43  ;;  %2536 = vmatprep.subr.bf16.mxu1 %v2535_v9  ;;  %v2559_v43 = vpack.c.bf16 %v846_v38, %v845_v37  ;;  %v1507_v38 = vld [vmem:[#allocation5 + $0x430] sm:$0xff] }
  0xaa   : > { %2664 = vmatprep.subr.bf16.mxu0 %v2663_v49  ;;  %2179 = vmatprep.mubr.f32.mxu1 %v3421_v24 }
  0xab   : > { %2355 = vmatprep.mubr.f32.mxu0 %v3258_v57 }
  0xac   : > { %2538 = vmatpush3.bf16.msra.mxu1 %v2535_v9  ;;  %v1378_v9 = vld [vmem:[#allocation5 + $0x3b8] sm:$0xff] }
  0xad   : > { %2666 = vmatpush3.bf16.msra.mxu0 %v2663_v49  ;;  %2540 = vmatprep.subr.bf16.mxu1 %v2539_v59  ;;  %v2691_v49 = vpack.c.bf16 %v1378_v9, %v1377_v47 }
  0xae   : > { %2668 = vmatprep.subr.bf16.mxu0 %v2667_v60 }
  0xb0   : > { %2542 = vmatpush3.bf16.msra.mxu1 %v2539_v59  ;;  %v2567_v59 = vpack.c.bf16 %v850_v51, %v849_v50 }
  0xb1   : > { %2670 = vmatpush3.bf16.msra.mxu0 %v2667_v60  ;;  %2544 = vmatprep.subr.bf16.mxu1 %v2543_v8  ;;  %v2695_v60 = vpack.c.bf16 %v1380_v58, %v1379_v52 }
  0xb2   : > { %2672 = vmatprep.subr.bf16.mxu0 %v2671_v10 }
  0xb4   : > { %2546 = vmatpush3.bf16.msra.mxu1 %v2543_v8  ;;  %v2571_v8 = vpack.c.bf16 %v852_v4, %v851_v1 }
  0xb5   : > { %2674 = vmatpush3.bf16.msra.mxu0 %v2671_v10  ;;  %2548 = vmatprep.subr.bf16.mxu1 %v2547_v21  ;;  %v2699_v10 = vpack.c.bf16 %v1382_v7, %v1381_v6 }
  0xb6   : > { %2676 = vmatprep.subr.bf16.mxu0 %v2675_v22 }
  0xb8   : > { %2550 = vmatpush3.bf16.msra.mxu1 %v2547_v21  ;;  %v2575_v21 = vpack.c.bf16 %v854_v14, %v853_v13 }
  0xb9   : > { %2678 = vmatpush3.bf16.msra.mxu0 %v2675_v22  ;;  %2552 = vmatprep.subr.bf16.mxu1 %v2551_v19  ;;  %v2703_v22 = vpack.c.bf16 %v1384_v20, %v1383_v15 }
  0xba   : > { %2680 = vmatprep.subr.bf16.mxu0 %v2679_v31 }
  0xbb   : > { %2180 = vmatmul.mubr.f32.vlgmr.msra.gmra.mrb[0].mxu1 %v3412_v3  ;;  %v2563_v3 = vpack.c.bf16 %v848_v29, %v847_v46 }
  0xbc   : > { %2554 = vmatpush3.bf16.msra.mxu1 %v2551_v19  ;;  %2356 = vmatmul.mubr.f32.vlgmr.msra.gmra.mrb[0].mxu0 %v3302_v54  ;;  %v2579_v19 = vpack.c.bf16 %v856_v26, %v855_v25 }
  0xbd   : > { %2682 = vmatpush3.bf16.msra.mxu0 %v2679_v31  ;;  %2556 = vmatprep.subr.bf16.mxu1 %v2555_v36  ;;  %v1501_v31 = vld [vmem:[#allocation5 + $0x400] sm:$0xff] }
  0xbe   : > { %2684 = vmatprep.subr.bf16.mxu0 %v2683_v45  ;;  %2182 = vmatprep.mubr.f32.mxu1 %v3421_v24 }
  0xbf   : > { %2358 = vmatprep.mubr.f32.mxu0 %v3313_v62  ;;  %2183 = vmatmul.mubr.f32.gmra.mrb[2].mxu1 %v3428_v55 }
  0xc0   : > { %2558 = vmatpush3.bf16.msra.mxu1 %v2555_v36  ;;  %2359 = vmatmul.mubr.f32.gmra.mrb[2].mxu0 %v3339_v17  ;;  %v1505_v36 = vld [vmem:[#allocation5 + $0x420] sm:$0xff] }
  0xc1   : > { %2686 = vmatpush3.bf16.msra.mxu0 %v2683_v45  ;;  %2560 = vmatprep.subr.bf16.mxu1 %v2559_v43  ;;  %v1506_v45 = vld [vmem:[#allocation5 + $0x428] sm:$0xff] }
  0xc2   : > { %2688 = vmatprep.subr.bf16.mxu0 %v2687_v44  ;;  %2185 = vmatprep.mubr.f32.mxu1 %v3433_v18  ;;  %v2719_v37 = vpack.c.bf16 %v1506_v45, %v1505_v36 }
  0xc3   : > { %2361 = vmatprep.mubr.f32.mxu0 %v3360_v28  ;;  %2186 = vmatmul.mubr.f32.gmra.mrb[4].mxu1 %v3442_v30 }
  0xc4   : > { %2562 = vmatpush3.bf16.msra.mxu1 %v2559_v43  ;;  %2362 = vmatmul.mubr.f32.gmra.mrb[4].mxu0 %v3374_v56 }
  0xc5   : > { %2690 = vmatpush3.bf16.msra.mxu0 %v2687_v44  ;;  %2564 = vmatprep.subr.bf16.mxu1 %v2563_v3  ;;  %v1833_v44 = vld [vmem:[%s3604_s2] ss:$0 sm:$0xff] }
  0xc6   : > { %2692 = vmatprep.subr.bf16.mxu0 %v2691_v49  ;;  %2188 = vmatprep.mubr.f32.mxu1 %v3447_v39 }
  0xc7   : > { %2364 = vmatprep.mubr.f32.mxu0 %v3388_v5  ;;  %2189 = vmatmul.mubr.f32.gmra.mrb[6].mxu1 %v3456_v0 }
  0xc8   : > { %2566 = vmatpush3.bf16.msra.mxu1 %v2563_v3  ;;  %2365 = vmatmul.mubr.f32.gmra.mrb[6].mxu0 %v3374_v56 }
  0xc9   : > { %2694 = vmatpush3.bf16.msra.mxu0 %v2691_v49  ;;  %2568 = vmatprep.subr.bf16.mxu1 %v2567_v59 }
  0xca   : > { %2696 = vmatprep.subr.bf16.mxu0 %v2695_v60  ;;  %2223 = vmatprep.mubr.f32.mxu1 %v3262_v2  ;;  %v2707_v2 = vpack.c.bf16 %v1386_v63, %v1385_v12 }
  0xcb   : > { %2399 = vmatprep.mubr.f32.mxu0 %v3327_v11  ;;  %v2711_v11 = vpack.c.bf16 %v1502_v32, %v1501_v31 }
  0xcc   : > { %2570 = vmatpush3.bf16.msra.mxu1 %v2567_v59 }
  0xcd   : > { %2698 = vmatpush3.bf16.msra.mxu0 %v2695_v60  ;;  %2572 = vmatprep.subr.bf16.mxu1 %v2571_v8 }
  0xce   : > { %2700 = vmatprep.subr.bf16.mxu0 %v2699_v10 }
  0xd0   : > { %2574 = vmatpush3.bf16.msra.mxu1 %v2571_v8 }
  0xd1   : > { %2702 = vmatpush3.bf16.msra.mxu0 %v2699_v10  ;;  %2576 = vmatprep.subr.bf16.mxu1 %v2575_v21 }
  0xd2   : > { %2704 = vmatprep.subr.bf16.mxu0 %v2703_v22 }
  0xd4   : > { %2578 = vmatpush3.bf16.msra.mxu1 %v2575_v21 }
  0xd5   : > { %2706 = vmatpush3.bf16.msra.mxu0 %v2703_v22  ;;  %2580 = vmatprep.subr.bf16.mxu1 %v2579_v19 }
  0xd6   : > { %2708 = vmatprep.subr.bf16.mxu0 %v2707_v2 }
  0xd8   : > { %2582 = vmatpush3.bf16.msra.mxu1 %v2579_v19 }
  0xd9   : > { %2710 = vmatpush3.bf16.msra.mxu0 %v2707_v2  ;;  %2743 = vmatprep.subr.bf16.mxu1 %v2711_v11 }
  0xda   : > { %2712 = vmatprep.subr.bf16.mxu0 %v2711_v11 }
  0xdb   : > { %2224 = vmatmul.mubr.f32.vlgmr.msra.gmra.mrb[0].mxu1 %v3258_v57  ;;  %v2723_v57 = vpack.c.bf16 %v1508_v40, %v1507_v38 }
  0xdc   : > { %2400 = vmatmul.mubr.f32.vlgmr.msra.gmra.mrb[0].mxu0 %v3343_v27  ;;  %2751 = vmatpush3.bf16.msra.mxu1 %v2711_v11  ;;  %v1510_v27 = vld [vmem:[#allocation5 + $0x448] sm:$0xff] }
  0xdd   : > { %2714 = vmatpush3.bf16.msra.mxu0 %v2711_v11  ;;  %2226 = vmatprep.mubr.f32.mxu1 %v3302_v54  ;;  %v1509_v54 = vld [vmem:[#allocation5 + $0x440] sm:$0xff] }
  0xde   : > { %2402 = vmatprep.mubr.f32.mxu0 %v3355_v41  ;;  %2716 = vmatprep.subr.bf16.mxu0 %v2715_v35  ;;  %v1512_v41 = vld [vmem:[#allocation5 + $0x458] sm:$0xff] }
  0xdf   : > { %2227 = vmatmul.mubr.f32.gmra.mrb[2].mxu1 %v3313_v62  ;;  %2744 = vmatprep.subr.bf16.mxu1 %v2715_v35  ;;  %v2727_v62 = vpack.c.bf16 %v1510_v27, %v1509_v54 }
  0xe0   : > { %2403 = vmatmul.mubr.f32.gmra.mrb[2].mxu0 %v3371_v53  ;;  %2752 = vmatpush3.bf16.msra.mxu1 %v2715_v35  ;;  %v1513_v53 = vld [vmem:[#allocation5 + $0x460] sm:$0xff] }
  0xe1   : > { %2718 = vmatpush3.bf16.msra.mxu0 %v2715_v35  ;;  %2229 = vmatprep.mubr.f32.mxu1 %v3339_v17  ;;  %v1511_v17 = vld [vmem:[#allocation5 + $0x450] sm:$0xff] }
  0xe2   : > { %2405 = vmatprep.mubr.f32.mxu0 %v3379_v61  ;;  %2720 = vmatprep.subr.bf16.mxu0 %v2719_v37  ;;  %v1514_v61 = vld [vmem:[#allocation5 + $0x468] sm:$0xff] }
  0xe3   : > { %2230 = vmatmul.mubr.f32.gmra.mrb[4].mxu1 %v3360_v28  ;;  %2745 = vmatprep.subr.bf16.mxu1 %v2719_v37  ;;  %v2731_v28 = vpack.c.bf16 %v1512_v41, %v1511_v17 }
  0xe4   : > { %2406 = vmatmul.mubr.f32.gmra.mrb[4].mxu0 %v3400_v16  ;;  %2753 = vmatpush3.bf16.msra.mxu1 %v2719_v37 }
  0xe5   : > { %2722 = vmatpush3.bf16.msra.mxu0 %v2719_v37  ;;  %2232 = vmatprep.mubr.f32.mxu1 %v3374_v56  ;;  %v2735_v56 = vpack.c.bf16 %v1514_v61, %v1513_v53 }
  0xe6   : > { %2408 = vmatprep.mubr.f32.mxu0 %v3405_v23  ;;  %2724 = vmatprep.subr.bf16.mxu0 %v2723_v57  ;;  %v1516_v23 = vld [vmem:[#allocation5 + $0x478] sm:$0xff] }
  0xe7   : > { %2233 = vmatmul.mubr.f32.gmra.mrb[6].mxu1 %v3388_v5  ;;  %2746 = vmatprep.subr.bf16.mxu1 %v2723_v57  ;;  %v1515_v5 = vld [vmem:[#allocation5 + $0x470] sm:$0xff] }
  0xe8   : > { %2409 = vmatmul.mubr.f32.gmra.mrb[6].mxu0 %v3400_v16  ;;  %2754 = vmatpush3.bf16.msra.mxu1 %v2723_v57  ;;  %v2739_v16 = vpack.c.bf16 %v1516_v23, %v1515_v5 }
  0xe9   : > { %2726 = vmatpush3.bf16.msra.mxu0 %v2723_v57  ;;  %2747 = vmatprep.subr.bf16.mxu1 %v2727_v62 }
  0xea   : > { %2728 = vmatprep.subr.bf16.mxu0 %v2727_v62  ;;  %2443 = vmatprep.mubr.f32.mxu0 %v3421_v24 }
  0xeb   : > { %2449 = vmatprep.mubr.f32.mxu1 %v3447_v39 }
  0xec   : > { %2755 = vmatpush3.bf16.msra.mxu1 %v2727_v62 }
  0xed   : > { %2730 = vmatpush3.bf16.msra.mxu0 %v2727_v62  ;;  %2748 = vmatprep.subr.bf16.mxu1 %v2731_v28 }
  0xee   : > { %2732 = vmatprep.subr.bf16.mxu0 %v2731_v28 }
  0xf0   : > { %2756 = vmatpush3.bf16.msra.mxu1 %v2731_v28 }
  0xf1   : > { %2734 = vmatpush3.bf16.msra.mxu0 %v2731_v28  ;;  %2749 = vmatprep.subr.bf16.mxu1 %v2735_v56 }
  0xf2   : > { %2736 = vmatprep.subr.bf16.mxu0 %v2735_v56 }
  0xf4   : > { %2757 = vmatpush3.bf16.msra.mxu1 %v2735_v56 }
  0xf5   : > { %2738 = vmatpush3.bf16.msra.mxu0 %v2735_v56  ;;  %2750 = vmatprep.subr.bf16.mxu1 %v2739_v16 }
  0xf6   : > { %2740 = vmatprep.subr.bf16.mxu0 %v2739_v16 }
  0xf8   : > { %2758 = vmatpush3.bf16.msra.mxu1 %v2739_v16 }
  0xf9   : > { %2742 = vmatpush3.bf16.msra.mxu0 %v2739_v16 }
  0xfb   : > { %2450 = vmatmul.mubr.f32.vlgmr.msra.gmra.mrb[8].mxu1 %v3456_v0 }
  0xfc   : > { %2444 = vmatmul.mubr.f32.vlgmr.msra.gmra.mrb[0].mxu0 %v3428_v55  ;;  %2452 = vmatprep.mubr.f32.mxu1 %v3459_v48 }
  0xfd   : > { %2446 = vmatprep.mubr.f32.mxu0 %v3433_v18 }
  0xff   : > { %2453 = vmatmul.mubr.f32.gmra.mrb[10].mxu1 %v3456_v0 }
 0x100   : > { %2447 = vmatmul.mubr.f32.gmra.mrb[2].mxu0 %v3442_v30 }
 0x1ae   : > { %v2225_v24 = vpop.f32.mrb[0].mxu1 }
 0x1af   : > { %v923_v39 = vpop.f32.mrb[1].mxu1  ;;  %v2759_v60 = vadd.f32 %v2225_v24, %v1833_v44 }
 0x1b0   : > { %v2761_v4 = vadd.f32 %v1833_v44, %v923_v39 }
 0x1b2   : > { %v2228_v42 = vpop.f32.mrb[2].mxu1 }
 0x1b3   : > { %v933_v43 = vpop.f32.mrb[3].mxu1  ;;  %v2763_v20 = vadd.f32 %v2228_v42, %v1833_v44 }
 0x1b4   : > { %v2765_v25 = vadd.f32 %v1833_v44, %v933_v43 }
 0x1b6   : > { %v2231_v46 = vpop.f32.mrb[4].mxu1 }
 0x1b7   : > { %v2767_v29 = vadd.f32 %v2231_v46, %v1833_v44  ;;  %v2407_v55 = vpop.f32.mrb[4].mxu0  ;;  %v943_v47 = vpop.f32.mrb[5].mxu1 }
 0x1b8   : > { %v2770_v48 = vadd.f32 %v1833_v44, %v943_v47  ;;  %v1473_v9 = vpop.f32.mrb[5].mxu0 }
 0x1b9   : > { %v2768_v18 = vadd.f32 %v2767_v29, %v2407_v55 }
 0x1ba   : > { %v2771_v3 = vadd.f32 %v2770_v48, %v1473_v9  ;;  %v2234_v0 = vpop.f32.mrb[6].mxu1 }
 0x1bb   : > { %v2773_v49 = vadd.f32 %v2234_v0, %v1833_v44  ;;  %v2410_v30 = vpop.f32.mrb[6].mxu0  ;;  %v953_v50 = vpop.f32.mrb[7].mxu1 }
 0x1bc   : > { %v2776_v51 = vadd.f32 %v1833_v44, %v953_v50  ;;  %v1483_v52 = vpop.f32.mrb[7].mxu0 }
 0x1bd   : > { %v2774_v58 = vadd.f32 %v2773_v49, %v2410_v30 }
 0x1be   : > { %v2777_v59 = vadd.f32 %v2776_v51, %v1483_v52 }
 0x1ce   : > { %v2451_v1 = vpop.f32.mrb[8].mxu1 }
 0x1cf   : > { %v2445_v6 = vpop.f32.mrb[0].mxu0  ;;  %v3509_v7 = vadd.f32 %v2768_v18, %v2451_v1  ;;  %v1603_v8 = vpop.f32.mrb[9].mxu1 }
 0x1d0   : > { %v2760_v10 = vadd.f32 %v2759_v60, %v2445_v6  ;;  %v1583_v13 = vpop.f32.mrb[1].mxu0  ;;  %v3511_v14 = vadd.f32 %v2771_v3, %v1603_v8 }
 0x1d1   : > { %1635 = vst [vmem:[%s234_s28 + $0x28] sm:$0xff] %v3509_v7  ;;  %v2762_v15 = vadd.f32 %v2761_v4, %v1583_v13 }
 0x1d2   : > { %1631 = vst [vmem:[%s234_s28 + $0x8] sm:$0xff] %v2760_v10  ;;  %v1653_v21 = vmul.f32 %v2760_v10, %v2760_v10  ;;  %1634 = vst [vmem:[%s234_s28 + $0x20] sm:$0xff] %v3511_v14  ;;  %v2454_v22 = vpop.f32.mrb[10].mxu1 }
 0x1d3   : > { %1630 = vst [vmem:[%s234_s28] sm:$0xff] %v2762_v15  ;;  %v1638_v26 = vadd.f32 %v2762_v15, %v2760_v10  ;;  %v1652_v12 = vmul.f32 %v2762_v15, %v2762_v15  ;;  %v2448_v63 = vpop.f32.mrb[2].mxu0  ;;  %v2775_v19 = vadd.f32 %v2774_v58, %v2454_v22  ;;  %v1613_v2 = vpop.f32.mrb[11].mxu1 }
 0x1d4   : > { %v2764_v31 = vadd.f32 %v2763_v20, %v2448_v63  ;;  %v1593_v32 = vpop.f32.mrb[3].mxu0  ;;  %v2778_v11 = vadd.f32 %v2777_v59, %v1613_v2 }
 0x1d5   : > { %v1660_v33 = vadd.f32 %v1653_v21, %v1652_v12  ;;  %1637 = vst [vmem:[%s234_s28 + $0x38] sm:$0xff] %v2775_v19  ;;  %v2766_v34 = vadd.f32 %v2765_v25, %v1593_v32 }
 0x1d6   : > { %1633 = vst [vmem:[%s234_s28 + $0x18] sm:$0xff] %v2764_v31  ;;  %1636 = vst [vmem:[%s234_s28 + $0x30] sm:$0xff] %v2778_v11 }
 0x1d7   : > { %1632 = vst [vmem:[%s234_s28 + $0x10] sm:$0xff] %v2766_v34  ;;  %v1639_v35 = vadd.f32 %v2766_v34, %v1638_v26  ;;  %v1654_v36 = vmul.f32 %v2766_v34, %v2766_v34 }
 0x1d8   : > { %2970 = shalt.err (!%p2967_p7)
}
 0x1d9   : > { %s2971_s14 = scalar_lea.hbm %s3521_s7, 1024  ;;  %s2975_s23 = scalar_lea.hbm %s3605_s3, 2048 }
 0x1da   : > { %p2972_p9 = scmp.ne.s32.totalorder %s3521_s7, %s2971_s14  ;;  %p2976_p5 = scmp.lt.u32.totalorder %s3521_s7, %s3605_s3 }
 0x1db   : > { %p2977_p11 = scmp.lt.u32.totalorder %s2975_s23, %s2971_s14  ;;  %p2979_p4 = scmp.lt.u32.totalorder %s2971_s14, %s3521_s7 }
 0x1dc   : > { %p2973_p2 = pnand %p2972_p9, %p3187_p12 }
 0x1dd   : > { %p2978_p1 = por %p2977_p11, %p2976_p5 }
 0x1de   : > { %p2974_p0 = pneg %p2973_p2 }
 0x1df   : > { %p2980_p6 = por %p2979_p4, %p2978_p1 }
 0x1e1   : > { %p2981_p8 = pnand %p2980_p6, %p2974_p0 }
 0x1e3   : > { %2984 = shalt.err (!%p2981_p8)
}
 0x1e4   : > { %s3068_s10 = smov 128   ;;  %s3069_s6 = smov 8   ;;  %v1655_v45 = vmul.f32 %v2764_v31, %v2764_v31  ;;  %v1640_v37 = vadd.f32 %v2764_v31, %v1639_v35  ;;  %v1661_v38 = vadd.f32 %v1660_v33, %v1654_v36  ;;  %v1656_v40 = vmul.f32 %v3511_v14, %v3511_v14 }
 0x1e5   : > { %2837 = dma.vmem_to_hbm [thread:$0]  (%p3187_p12), %s3516_s29, 1024, %s3521_s7, %s1675_s26, %s3068_s10, %s3068_s10, %s3069_s6   ;;  %v1657_v27 = vmul.f32 %v3509_v7, %v3509_v7  ;;  %v1658_v28 = vmul.f32 %v2778_v11, %v2778_v11  ;;  %v1659_v61 = vmul.f32 %v2775_v19, %v2775_v19 }
 0x1e6   : > { %v1662_v57 = vadd.f32 %v1661_v38, %v1655_v45  ;;  %v1641_v54 = vadd.f32 %v3511_v14, %v1640_v37  ;;  %s1832_s29 = sshll.u32 %s3235_s12, 1  ;;  %s1838_s5 = sshll.u32 %s3117_s19, 5 }
 0x1e7   : > { %s241_s7 = scalar_lea.vmem [#allocation8], %s1832_s29  ;;  %s3558_s11 = scalar_lea.hbm %s3606_s4, %s1838_s5 }
 0x1e8   : > { %v1642_v62 = vadd.f32 %v3509_v7, %v1641_v54  ;;  %v1663_v17 = vadd.f32 %v1662_v57, %v1656_v40  ;;  %s1709_s26 = sshll.u32 %s241_s7, 4  ;;  %s1680_s13 = scalar_lea.sflag [#allocation9], %s3235_s12  ;;  %s3560_s26 = int_to_ptr.vmem [resolvable:$true] %s1709_s26 }
 0x1e9   : > { %s2985_s14 = scalar_lea.vmem %s3560_s26, 32  ;;  %s3070_s19 = smov [#allocation8]  }
 0x1ea   : > { %v1643_v41 = vadd.f32 %v2778_v11, %v1642_v62  ;;  %v1664_v53 = vadd.f32 %v1663_v17, %v1657_v27  ;;  %p2986_p10 = scmp.ne.s32.totalorder %s3560_s26, %s2985_s14  ;;  %s2989_s20 = sshll.u32 %s3070_s19, 4  ;;  %s2990_s20 = int_to_ptr.vmem [resolvable:$false] %s2989_s20 }
 0x1eb   : > { %s2991_s21 = scalar_lea.vmem %s2990_s20, 64  ;;  %p2992_p7 = scmp.lt.s32.totalorder %s3560_s26, %s2990_s20 }
 0x1ec   : > { %v1644_v56 = vadd.f32 %v2775_v19, %v1643_v41  ;;  %v1665_v5 = vadd.f32 %v1664_v53, %v1658_v28  ;;  %p2987_p13 = pnand %p2986_p10, %p3187_p12  ;;  %p2993_p9 = scmp.lt.s32.totalorder %s2991_s21, %s2985_s14 }
 0x1ee   : > { %v1645_v23 = vrot.slane %v1644_v56, 4  ;;  %v1666_v16 = vadd.f32 %v1665_v5, %v1659_v61  ;;  %p2988_p3 = pneg %p2987_p13  ;;  %p2994_p2 = por %p2993_p9, %p2992_p7 }
 0x1f0   : > { %v1646_v24 = vadd.f32 %v1645_v23, %v1644_v56  ;;  %v1667_v39 = vrot.slane %v1666_v16, 4  ;;  %p2995_p0 = pnand %p2994_p2, %p2988_p3 }
 0x1f2   : > { %v1647_v42 = vrot.slane %v1646_v24, 2  ;;  %v1668_v43 = vadd.f32 %v1667_v39, %v1666_v16 }
 0x1f4   : > { %v1648_v44 = vadd.f32 %v1647_v42, %v1646_v24  ;;  %v1669_v46 = vrot.slane %v1668_v43, 2 }
 0x1f6   : > { %v1649_v29 = vrot.slane %v1648_v44, 1  ;;  %v1670_v55 = vadd.f32 %v1669_v46, %v1668_v43 }
 0x1f8   : > { %v1650_v47 = vadd.f32 %v1649_v29, %v1648_v44  ;;  %v1671_v48 = vrot.slane %v1670_v55, 1 }
 0x1fa   : > { %1651 = vst [vmem:[%s241_s7] sm:$0x1] %v1650_v47  ;;  %v1672_v9 = vadd.f32 %v1671_v48, %v1670_v55 }
 0x1fc   : > { %1673 = vst [vmem:[%s241_s7 + $0x1] sm:$0x1] %v1672_v9 }
 0x1fd   : > { %2998 = shalt.err (!%p2995_p0)
}
 0x1fe   : > { %s2999_s12 = scalar_lea.hbm %s3558_s11, 32  ;;  %s3003_s28 = scalar_lea.hbm %s3606_s4, 64 }
 0x1ff   : > { %p3000_p5 = scmp.ne.s32.totalorder %s3558_s11, %s2999_s12  ;;  %p3004_p4 = scmp.lt.u32.totalorder %s3558_s11, %s3606_s4 }
 0x200   : > { %p3005_p6 = scmp.lt.u32.totalorder %s3003_s28, %s2999_s12  ;;  %p3007_p10 = scmp.lt.u32.totalorder %s2999_s12, %s3558_s11 }
 0x201   : > { %p3001_p11 = pnand %p3000_p5, %p3187_p12 }
 0x202   : > { %p3006_p8 = por %p3005_p6, %p3004_p4 }
 0x203   : > { %p3002_p1 = pneg %p3001_p11 }
 0x204   : > { %p3008_p13 = por %p3007_p10, %p3006_p8 }
 0x206   : > { %p3009_p3 = pnand %p3008_p13, %p3002_p1 }
 0x208   : > { %3012 = shalt.err (!%p3009_p3)
}
 0x209   : > { %2838 = dma.vmem_to_hbm [thread:$0]  (%p3187_p12), %s3560_s26, 32, %s3558_s11, %s1680_s13  }
 0x20a PF: > { %s1721_s29 = sand.u32 1, %s3047_s15   ;;  %p3621_p7 = scmp.ne.s32.totalorder %s3611_s22, 0 }
 0x20b   : > { %p3622_p9 = scmp.ge.s32.totalorder %s3059_s18, 2  ;;  %s1722_s5 = scalar_lea.sflag [#allocation4], %s1721_s29 }
 0x20d   : > { %p2850_p2 = pnand %p3622_p9, %p3621_p7 }
 0x20f   : > { %3038 = dma.done.wait (!%p2850_p2), %s1722_s5, 1024  }
 0x210   : > { %3040 = vsyncadd (!%p2850_p2), %s1722_s5, 4294966272  ;;  %s1731_s7 = scalar_lea.sflag [#allocation9], %s1721_s29 }
 0x211   : > { %3042 = dma.done.wait (!%p2850_p2), %s1731_s7, 32  }
 0x212   : > { %3044 = vsyncadd (!%p2850_p2), %s1731_s7, 4294967264  ;;  %p22_p12 = scmp.ge.s32.totalorder %s3152_s27, 4   ;;  %s3623_s15 = smov %s3051_s16 }
 0x213   : > { %s3624_s16 = smov %s3055_s17  ;;  %s3625_s17 = smov %s3183_s24 }
 0x214   : > { %s3626_s18 = smov %s3152_s27  ;;  %24 = sbr.rel (!%p22_p12) target bundleno = 8 (0x8), region = 106 }
 0x21b   :  { %1736 = vsyncpa [#allocation3], 1 }
 0x21c   :  { %1738 = vsyncpa [#allocation3 + $0x1], 1 }
 0x21d   :  { %1739 = vsyncpa [#allocation6], 1 }
 0x21e   :  { %1740 = vsyncpa [#allocation4], 1 }
 0x21f   :  { %1742 = vsyncpa [#allocation4 + $0x1], 1 }
 0x220   :  { %1743 = vsyncpa [#allocation9], 1 }
 0x221   :  { %1745 = vsyncpa [#allocation9 + $0x1], 1 }

</bundles_post_ra>
